<compile_context>
chip_gen: v7x
topology: tpu7x:2x2x1
jax: 0.10.0
libtpu: 0.0.40
codegen_flags: <defaults>
</compile_context>

<pallas_src>
import jax
import jax.numpy as jnp
from jax.experimental import pallas as pl
from jax.experimental.pallas import tpu as pltpu

HIDDEN = 64
LN_EPS = 1e-5


def ratio_regressor_kernel(enc_ref, ratio_ref, we_ref, be_ref,
                           w1_ref, b1_ref, w2_ref, b2_ref, o_ref):
    blk_b, P, D = enc_ref.shape
    H = w1_ref.shape[-1]

    # ratio_embed computed in-kernel: tiny (blk_b, P) x (P, D) MXU GEMM.
    emb = jnp.dot(ratio_ref[...], we_ref[...],
                  preferred_element_type=jnp.float32) + be_ref[...]          # (blk_b, D) f32

    # Residual add in the storage dtype, fed straight to the MXU (no f32 copy).
    x = enc_ref[...] + emb[:, None, :].astype(enc_ref.dtype)                 # (blk_b, P, D)

    # Single MXU GEMM over all blk_b*P rows of this block (rows multiple of 8,
    # D is the full feature dim -> tile-aligned collapse).
    h = jnp.dot(x.reshape(blk_b * P, D), w1_ref[...],
                preferred_element_type=jnp.float32)                          # (R, H) f32
    h = jnp.maximum(h + b1_ref[...], 0.0)

    # Single-pass LayerNorm over H (elementwise_affine=False), f32.
    mean = jnp.mean(h, axis=-1, keepdims=True)
    ms = jnp.mean(h * h, axis=-1, keepdims=True)
    var = jnp.maximum(ms - mean * mean, 0.0)
    hn = (h - mean) * jax.lax.rsqrt(var + LN_EPS)

    # Dropout(0.5): identity at inference.

    # Linear(H -> 1): VPU multiply + lane reduce (keep it off the MXU).
    hw = hn * w2_ref[...]                                                    # (R, H)
    logits = jnp.sum(hw.reshape(blk_b, P, H), axis=-1) + b2_ref[0, 0]        # (blk_b, P)

    # Softmax over num_parts -- lane axis, lane-dense output.  approx=False
    # keeps the row-sum == 1 check tight; approx=True is a free EUP option.
    m = jnp.max(logits, axis=-1, keepdims=True)
    e = jnp.exp(logits - m)
    inv = pl.reciprocal(jnp.sum(e, axis=-1, keepdims=True), approx=False)
    o_ref[...] = (e * inv).astype(o_ref.dtype)


def _choose_block_b(B, P, D, H, enc_itemsize, target_rows, vmem_budget_bytes):
    """Pick a batch block size: large (amortize per-step overhead), multiple of 8,
    generation-aware VMEM accounting incl. f32 temporaries, >= 2 grid steps."""
    weights_bytes = (P * D + D + D * H + H + H + 1) * 4

    def accounted(bb):
        enc_blk = bb * P * D * enc_itemsize          # streamed enc block
        io_blk = 2 * bb * P * 4                      # ratio block + out block (f32)
        x_tmp = bb * P * D * enc_itemsize            # residual-add temporary
        f32_tmp = 3 * bb * P * H * 4                 # h / hn / elementwise temporaries
        return 2 * (enc_blk + io_blk) + x_tmp + f32_tmp + 2 * weights_bytes

    bb = max(8, (max(1, target_rows // P) + 7) // 8 * 8)
    # Never exceed the (8-rounded) batch itself.
    bb = min(bb, max(8, pl.cdiv(B, 8) * 8))
    # Keep >= 2 grid steps so the "parallel" axis can shard over v7x's 2 TCs.
    if B > 8:
        bb = min(bb, max(8, (pl.cdiv(B, 2) // 8) * 8))
    while bb > 8 and accounted(bb) > vmem_budget_bytes:
        bb -= 8
    return bb, accounted(bb), weights_bytes


def ratio_regressor(enc, ratio, params, *, target_rows=8192,
                    vmem_budget_bytes=32 * 2**20):
    """enc: (B, P, D) [f32 or bf16, streamed as-is], ratio: (B, P) f32
    -> (B, P) f32 softmax over P."""
    B, P, D = enc.shape
    we, be, w1, b1, w2, b2 = params
    H = w1.shape[1]
    enc_itemsize = jnp.dtype(enc.dtype).itemsize

    blk_b, need, weights_bytes = _choose_block_b(
        B, P, D, H, enc_itemsize, target_rows, vmem_budget_bytes)
    grid = (pl.cdiv(B, blk_b),)          # partial last block instead of jnp.pad

    # Tiny (D, H) weight cast so the MXU runs in the enc storage dtype; enc
    # itself is never copied / cast / padded in the wrapper.
    w1_s = w1.astype(enc.dtype)

    # Explicit scoped-VMEM limit: enough for the accounted need (<= 32 MiB),
    # capped at 56 MiB so the same code stays safe on v7x's 64 MiB per TC.
    vmem_limit = int(min(max(2 * need, 32 * 2**20), 56 * 2**20))

    cost = pl.CostEstimate(
        flops=int(2 * B * P * D * H + 2 * B * P * D + 8 * B * P * H),
        transcendentals=int(2 * B * P),
        bytes_accessed=int(B * P * D * enc_itemsize + 2 * B * P * 4 + weights_bytes),
    )

    return pl.pallas_call(
        ratio_regressor_kernel,
        out_shape=jax.ShapeDtypeStruct((B, P), jnp.float32),
        grid=grid,
        in_specs=[
            pl.BlockSpec((blk_b, P, D), lambda i: (i, 0, 0)),   # encoder_output (streamed as-is)
            pl.BlockSpec((blk_b, P), lambda i: (i, 0)),         # input_ratio block
            pl.BlockSpec((P, D), lambda i: (0, 0)),             # ratio_embed weight^T (grid-invariant)
            pl.BlockSpec((1, D), lambda i: (0, 0)),             # ratio_embed bias
            pl.BlockSpec((D, H), lambda i: (0, 0)),             # fc1 weight^T
            pl.BlockSpec((1, H), lambda i: (0, 0)),             # fc1 bias
            pl.BlockSpec((1, H), lambda i: (0, 0)),             # fc2 weight (row)
            pl.BlockSpec(memory_space=pltpu.MemorySpace.SMEM),  # fc2 bias scalar -> SMEM
        ],
        out_specs=pl.BlockSpec((blk_b, P), lambda i: (i, 0)),   # lane-dense (B, P)
        compiler_params=pltpu.CompilerParams(
            dimension_semantics=("parallel",),
            vmem_limit_bytes=vmem_limit,
        ),
        cost_estimate=cost,
    )(enc, ratio, we, be, w1_s, b1, w2, b2)


def reference(enc, ratio, params):
    we, be, w1, b1, w2, b2 = params
    emb = ratio @ we + be                                   # (B, D)
    x = enc + emb[:, None, :]                               # (B, P, D)
    h = jnp.maximum(x @ w1 + b1, 0.0)                       # (B, P, H)
    mean = jnp.mean(h, axis=-1, keepdims=True)
    var = jnp.mean(jnp.square(h - mean), axis=-1, keepdims=True)
    hn = (h - mean) * jax.lax.rsqrt(var + LN_EPS)
    logits = jnp.sum(hn * w2, axis=-1) + b2[0, 0]           # (B, P)
    return jax.nn.softmax(logits, axis=-1)


def init_params(key, num_parts, input_dim):
    # Deterministic init mimicking PyTorch Linear default U[-1/sqrt(fan_in), +1/sqrt(fan_in)].
    ks = jax.random.split(key, 6)
    P, D, H = num_parts, input_dim, HIDDEN

    def u(k, shape, fan_in):
        bound = 1.0 / jnp.sqrt(fan_in)
        return jax.random.uniform(k, shape, jnp.float32, -bound, bound)

    we = u(ks[0], (P, D), P)       # ratio_embed.weight^T
    be = u(ks[1], (1, D), P)       # ratio_embed.bias
    w1 = u(ks[2], (D, H), D)       # regressor fc1 weight^T
    b1 = u(ks[3], (1, H), D)       # regressor fc1 bias
    w2 = u(ks[4], (1, H), H)       # regressor fc2 weight (row vector)
    b2 = u(ks[5], (1, 1), H)       # regressor fc2 bias
    return (we, be, w1, b1, w2, b2)


if __name__ == "__main__":
    # (8, 128)-aligned small shapes: parts=8, feature dim=128.
    B, P, D = 64, 8, 128
    key = jax.random.PRNGKey(0)
    k_enc, k_ratio, k_param = jax.random.split(key, 3)

    encoder_output = jax.random.normal(k_enc, (B, P, D), jnp.float32)
    input_ratio = jax.nn.softmax(jax.random.normal(k_ratio, (B, P), jnp.float32), axis=-1)
    params = init_params(k_param, P, D)

    ref = reference(encoder_output, input_ratio, params)

    # f32 path (tolerance allows for MXU-vs-XLA f32 matmul path differences).
    out = jax.block_until_ready(ratio_regressor(encoder_output, input_ratio, params))
    assert out.shape == (B, P)
    assert jnp.allclose(out, ref, atol=2e-3, rtol=2e-3)
    assert jnp.allclose(jnp.sum(out, axis=-1), 1.0, atol=1e-4)

    # bf16 path: enc arrives already in bf16 from upstream (no wrapper-side cast).
    enc_bf16 = encoder_output.astype(jnp.bfloat16)
    out_bf16 = jax.block_until_ready(ratio_regressor(enc_bf16, input_ratio, params))
    assert out_bf16.shape == (B, P)
    assert jnp.allclose(out_bf16, ref, atol=3e-2, rtol=3e-2)

    # Non-dividing batch exercises the partial last block (no jnp.pad anywhere).
    B2 = 50
    out_odd = jax.block_until_ready(
        ratio_regressor(encoder_output[:B2], input_ratio[:B2], params))
    assert out_odd.shape == (B2, P)
    assert jnp.allclose(out_odd, ref[:B2], atol=2e-3, rtol=2e-3)

    print("KERNEL_OK")
</pallas_src>

<mosaic_0001>
module attributes {stable_mosaic.version = 11 : i64} {
  func.func @ratio_regressor_kernel(%arg0: i32, %arg1: memref<32x8x128xf32, #tpu.memory_space<vmem>>, %arg2: memref<32x8xf32, #tpu.memory_space<vmem>>, %arg3: memref<8x128xf32, #tpu.memory_space<vmem>>, %arg4: memref<1x128xf32, #tpu.memory_space<vmem>>, %arg5: memref<128x64xf32, #tpu.memory_space<vmem>>, %arg6: memref<1x64xf32, #tpu.memory_space<vmem>>, %arg7: memref<1x64xf32, #tpu.memory_space<vmem>>, %arg8: memref<1x1xf32, #tpu.memory_space<smem>>, %arg9: memref<32x8xf32, #tpu.memory_space<vmem>>) attributes {dimension_semantics = [#tpu.dimension_semantics<parallel>], iteration_bounds = array<i64: 2>, scalar_prefetch = 0 : i64, scratch_operands = 0 : i64, tpu.core_type = #tpu.core_type<tc>, window_params = [{transform_indices = @transform_0, window_bounds = array<i64: 32, 8, 128>}, {transform_indices = @transform_1, window_bounds = array<i64: 32, 8>}, {pipeline_mode = #tpu.pipeline_mode<synchronous>, transform_indices = @transform_2, window_bounds = array<i64: 8, 128>}, {pipeline_mode = #tpu.pipeline_mode<synchronous>, transform_indices = @transform_3, window_bounds = array<i64: 1, 128>}, {pipeline_mode = #tpu.pipeline_mode<synchronous>, transform_indices = @transform_4, window_bounds = array<i64: 128, 64>}, {pipeline_mode = #tpu.pipeline_mode<synchronous>, transform_indices = @transform_5, window_bounds = array<i64: 1, 64>}, {pipeline_mode = #tpu.pipeline_mode<synchronous>, transform_indices = @transform_6, window_bounds = array<i64: 1, 64>}, {transform_indices = @transform_7, window_bounds = array<i64: 1, 1>}, {transform_indices = @transform_8, window_bounds = array<i64: 32, 8>}]} {
    %c0 = arith.constant 0 : index
    %c0_0 = arith.constant 0 : index
    %0 = vector.load %arg2[%c0, %c0_0] : memref<32x8xf32, #tpu.memory_space<vmem>>, vector<32x8xf32>
    %c0_1 = arith.constant 0 : index
    %c0_2 = arith.constant 0 : index
    %1 = vector.load %arg3[%c0_1, %c0_2] : memref<8x128xf32, #tpu.memory_space<vmem>>, vector<8x128xf32>
    %cst = arith.constant dense<0.000000e+00> : vector<32x128xf32>
    %2 = tpu.matmul %0, %1, %cst {dimension_numbers = #tpu.dot_dimension_numbers<[1], [0], [0], [1], [0, 0, 1, 1], [], []>} : vector<32x8xf32>, vector<8x128xf32>, vector<32x128xf32> -> vector<32x128xf32>
    %c0_3 = arith.constant 0 : index
    %c0_4 = arith.constant 0 : index
    %3 = vector.load %arg4[%c0_3, %c0_4] : memref<1x128xf32, #tpu.memory_space<vmem>>, vector<1x128xf32>
    %4 = vector.broadcast %3 : vector<1x128xf32> to vector<32x128xf32>
    %5 = arith.addf %2, %4 : vector<32x128xf32>
    %c0_5 = arith.constant 0 : index
    %c0_6 = arith.constant 0 : index
    %c0_7 = arith.constant 0 : index
    %6 = vector.load %arg1[%c0_5, %c0_6, %c0_7] : memref<32x8x128xf32, #tpu.memory_space<vmem>>, vector<32x8x128xf32>
    %7 = vector.shape_cast %5 : vector<32x128xf32> to vector<32x1x128xf32>
    %8 = vector.broadcast %7 : vector<32x1x128xf32> to vector<32x8x128xf32>
    %9 = arith.addf %6, %8 : vector<32x8x128xf32>
    %10 = vector.shape_cast %9 : vector<32x8x128xf32> to vector<256x128xf32>
    %c0_8 = arith.constant 0 : index
    %c0_9 = arith.constant 0 : index
    %11 = vector.load %arg5[%c0_8, %c0_9] : memref<128x64xf32, #tpu.memory_space<vmem>>, vector<128x64xf32>
    %cst_10 = arith.constant dense<0.000000e+00> : vector<256x64xf32>
    %12 = tpu.matmul %10, %11, %cst_10 {dimension_numbers = #tpu.dot_dimension_numbers<[1], [0], [0], [1], [0, 0, 1, 1], [], []>} : vector<256x128xf32>, vector<128x64xf32>, vector<256x64xf32> -> vector<256x64xf32>
    %c0_11 = arith.constant 0 : index
    %c0_12 = arith.constant 0 : index
    %13 = vector.load %arg6[%c0_11, %c0_12] : memref<1x64xf32, #tpu.memory_space<vmem>>, vector<1x64xf32>
    %14 = vector.broadcast %13 : vector<1x64xf32> to vector<256x64xf32>
    %15 = arith.addf %12, %14 : vector<256x64xf32>
    %cst_13 = arith.constant 0.000000e+00 : f32
    %16 = vector.broadcast %cst_13 : f32 to vector<256x64xf32>
    %17 = arith.maximumf %15, %16 : vector<256x64xf32>
    %cst_14 = arith.constant dense<0.000000e+00> : vector<256xf32>
    %18 = vector.multi_reduction <add>, %17, %cst_14 [1] : vector<256x64xf32> to vector<256xf32>
    %19 = vector.shape_cast %18 : vector<256xf32> to vector<256x1xf32>
    %cst_15 = arith.constant 6.400000e+01 : f32
    %20 = vector.broadcast %cst_15 : f32 to vector<256x1xf32>
    %21 = arith.divf %19, %20 : vector<256x1xf32>
    %22 = arith.mulf %17, %17 : vector<256x64xf32>
    %cst_16 = arith.constant dense<0.000000e+00> : vector<256xf32>
    %23 = vector.multi_reduction <add>, %22, %cst_16 [1] : vector<256x64xf32> to vector<256xf32>
    %24 = vector.shape_cast %23 : vector<256xf32> to vector<256x1xf32>
    %cst_17 = arith.constant 6.400000e+01 : f32
    %25 = vector.broadcast %cst_17 : f32 to vector<256x1xf32>
    %26 = arith.divf %24, %25 : vector<256x1xf32>
    %27 = arith.mulf %21, %21 : vector<256x1xf32>
    %28 = arith.subf %26, %27 : vector<256x1xf32>
    %cst_18 = arith.constant 0.000000e+00 : f32
    %29 = vector.broadcast %cst_18 : f32 to vector<256x1xf32>
    %30 = arith.maximumf %28, %29 : vector<256x1xf32>
    %31 = vector.broadcast %21 : vector<256x1xf32> to vector<256x64xf32>
    %32 = arith.subf %17, %31 : vector<256x64xf32>
    %cst_19 = arith.constant 9.99999974E-6 : f32
    %33 = vector.broadcast %cst_19 : f32 to vector<256x1xf32>
    %34 = arith.addf %30, %33 : vector<256x1xf32>
    %35 = math.rsqrt %34 : vector<256x1xf32>
    %36 = vector.broadcast %35 : vector<256x1xf32> to vector<256x64xf32>
    %37 = arith.mulf %32, %36 : vector<256x64xf32>
    %c0_20 = arith.constant 0 : index
    %c0_21 = arith.constant 0 : index
    %38 = vector.load %arg7[%c0_20, %c0_21] : memref<1x64xf32, #tpu.memory_space<vmem>>, vector<1x64xf32>
    %39 = vector.broadcast %38 : vector<1x64xf32> to vector<256x64xf32>
    %40 = arith.mulf %37, %39 : vector<256x64xf32>
    %41 = vector.shape_cast %40 : vector<256x64xf32> to vector<32x8x64xf32>
    %cst_22 = arith.constant dense<0.000000e+00> : vector<32x8xf32>
    %42 = vector.multi_reduction <add>, %41, %cst_22 [2] : vector<32x8x64xf32> to vector<32x8xf32>
    %c0_23 = arith.constant 0 : index
    %c0_24 = arith.constant 0 : index
    %43 = memref.load %arg8[%c0_23, %c0_24] : memref<1x1xf32, #tpu.memory_space<smem>>
    %44 = vector.broadcast %43 : f32 to vector<32x8xf32>
    %45 = arith.addf %42, %44 : vector<32x8xf32>
    %cst_25 = arith.constant dense<0xFF800000> : vector<32xf32>
    %46 = vector.multi_reduction <maximumf>, %45, %cst_25 [1] : vector<32x8xf32> to vector<32xf32>
    %47 = vector.shape_cast %46 : vector<32xf32> to vector<32x1xf32>
    %48 = vector.broadcast %47 : vector<32x1xf32> to vector<32x8xf32>
    %49 = arith.subf %45, %48 : vector<32x8xf32>
    %50 = math.exp %49 : vector<32x8xf32>
    %cst_26 = arith.constant dense<0.000000e+00> : vector<32xf32>
    %51 = vector.multi_reduction <add>, %50, %cst_26 [1] : vector<32x8xf32> to vector<32xf32>
    %52 = vector.shape_cast %51 : vector<32xf32> to vector<32x1xf32>
    %53 = tpu.reciprocal %52 : vector<32x1xf32> -> vector<32x1xf32>
    %54 = vector.broadcast %53 : vector<32x1xf32> to vector<32x8xf32>
    %55 = arith.mulf %50, %54 : vector<32x8xf32>
    %c0_27 = arith.constant 0 : index
    %c0_28 = arith.constant 0 : index
    %56 = vector.load %arg9[%c0_27, %c0_28] : memref<32x8xf32, #tpu.memory_space<vmem>>, vector<32x8xf32>
    tpu.vector_store %arg9[%c0_27, %c0_28], %55 {strides = array<i32>} : memref<32x8xf32, #tpu.memory_space<vmem>>, vector<32x8xf32>,
    return
  }
  func.func @transform_0(%arg0: i32) -> (i32, i32, i32) {
    %c0_i32 = arith.constant 0 : i32
    %c0_i32_0 = arith.constant 0 : i32
    %c0_i32_1 = arith.constant 0 : i32
    return %arg0, %c0_i32, %c0_i32_0 : i32, i32, i32
  }
  func.func @transform_1(%arg0: i32) -> (i32, i32) {
    %c0_i32 = arith.constant 0 : i32
    %c0_i32_0 = arith.constant 0 : i32
    return %arg0, %c0_i32 : i32, i32
  }
  func.func @transform_2(%arg0: i32) -> (i32, i32) {
    %c0_i32 = arith.constant 0 : i32
    %c0_i32_0 = arith.constant 0 : i32
    %c0_i32_1 = arith.constant 0 : i32
    return %c0_i32, %c0_i32_0 : i32, i32
  }
  func.func @transform_3(%arg0: i32) -> (i32, i32) {
    %c0_i32 = arith.constant 0 : i32
    %c0_i32_0 = arith.constant 0 : i32
    %c0_i32_1 = arith.constant 0 : i32
    return %c0_i32, %c0_i32_0 : i32, i32
  }
  func.func @transform_4(%arg0: i32) -> (i32, i32) {
    %c0_i32 = arith.constant 0 : i32
    %c0_i32_0 = arith.constant 0 : i32
    %c0_i32_1 = arith.constant 0 : i32
    return %c0_i32, %c0_i32_0 : i32, i32
  }
  func.func @transform_5(%arg0: i32) -> (i32, i32) {
    %c0_i32 = arith.constant 0 : i32
    %c0_i32_0 = arith.constant 0 : i32
    %c0_i32_1 = arith.constant 0 : i32
    return %c0_i32, %c0_i32_0 : i32, i32
  }
  func.func @transform_6(%arg0: i32) -> (i32, i32) {
    %c0_i32 = arith.constant 0 : i32
    %c0_i32_0 = arith.constant 0 : i32
    %c0_i32_1 = arith.constant 0 : i32
    return %c0_i32, %c0_i32_0 : i32, i32
  }
  func.func @transform_7(%arg0: i32) -> (i32, i32) {
    %c0_i32 = arith.constant 0 : i32
    %c0_i32_0 = arith.constant 0 : i32
    %c0_i32_1 = arith.constant 0 : i32
    return %c0_i32, %c0_i32_0 : i32, i32
  }
  func.func @transform_8(%arg0: i32) -> (i32, i32) {
    %c0_i32 = arith.constant 0 : i32
    %c0_i32_0 = arith.constant 0 : i32
    return %arg0, %c0_i32 : i32, i32
  }
}

</mosaic_0001>

<bundles_post_ra>
// kernel: tpu_custom_call.1
= control target key start
LH: loop header
LB: loop body
LE: loop exit
PB: predicated region body
PF: predicated region fallthrough
CT: control target
= control target key end

     0   :  { %s5157_s0 = inlined_call_operand.hbm [shape: f32[64,8,128], index: 0, kind: input, shape index: {}]   ;;  %s5158_s1 = inlined_call_operand.vmem [shape: f32[64,8], index: 1, kind: input, shape index: {}]   ;;  %s5159_s2 = inlined_call_operand.vmem [shape: f32[8,128], index: 2, kind: input, shape index: {}]   ;;  %s5160_s3 = inlined_call_operand.vmem [shape: f32[1,128], index: 3, kind: input, shape index: {}]   ;;  %s5161_s4 = inlined_call_operand.vmem [shape: f32[128,64], index: 4, kind: input, shape index: {}]   ;;  %s5162_s5 = inlined_call_operand.vmem [shape: f32[1,64], index: 5, kind: input, shape index: {}]   ;;  %s5163_s6 = inlined_call_operand.vmem [shape: f32[1,64], index: 6, kind: input, shape index: {}]   ;;  %s5164_s7 = inlined_call_operand.<no memory space> [shape: f32[1,1], index: 7, kind: input, shape index: {}]   ;;  %s5165_s8 = inlined_call_operand.vmem [shape: f32[64,8], index: 8, kind: output, shape index: {}]  }
   0x1   :  { %13 = sst [smem:[#allocation2]] %s5164_s7 }
   0x2   :  { %14 = vsyncpa [#allocation4], 0 }
   0x3   :  { %16 = vsyncpa [#allocation4 + $0x1], 0  ;;  %s3704_s29 = smov 0   ;;  %s3706_s30 = smov 0  }
   0x4   :  { %s3708_s9 = smov 0   ;;  %s3710_s10 = smov 0  }
   0x5 LB: > { %s3192_s7 = sadd.s32 4294967295, %s3649_s10   ;;  %s3724_s11 = sadd.s32 1, %s3649_s10   ;;  %s3649_s10 = sphi %s3710_s10, %s5175_s10   ;;  %s3645_s9 = sphi %s3708_s9, %s5174_s9   ;;  %s3641_s30 = sphi %s3706_s30, %s5173_s30   ;;  %s3637_s29 = sphi %s3704_s29, %s5172_s29  }
   0x6   : > { %s26_s12 = ssub.s32 %s3649_s10, %s3724_s11  ;;  %s29_s13 = sadd.s32 1, %s3645_s9 }
   0x7   : > { %p27_p0 = scmp.eq.s32.totalorder %s26_s12, 0  ;;  %p36_p1 = scmp.ne.s32.totalorder %s3645_s9, %s3641_s30 }
   0x8   : > { %p37_p2 = scmp.eq.s32.totalorder %s3649_s10, 0  ;;  %p42_p3 = scmp.ne.s32.totalorder %s3641_s30, %s3637_s29 }
   0x9   : > { %s3734_s14 = scalar_select %p27_p0, %s3645_s9, %s29_s13  }
   0xa   : > { %p38_p4 = por %p37_p2, %p36_p1  ;;  %p43_p5 = scmp.eq.s32.totalorder %s3192_s7, 0 }
   0xb   : > { %p3410_p6 = scmp.lt.s32.totalorder %s3649_s10, 2  ;;  %s262_s16 = sand.u32 1, %s3645_s9  }
   0xc   : > { %p3739_p7 = por %p43_p5, %p42_p3  ;;  %s3196_s17 = sshll.u32 %s262_s16, 8 }
   0xd   : > { %s3214_s18 = sshll.u32 %s3649_s10, 12  ;;  %s266_s22 = scalar_lea.vmem [#allocation3], %s3196_s17 }
   0xe   : > { %s3748_s21 = scalar_lea.hbm %s5157_s0, %s3214_s18  ;;  %s273_s23 = sshll.u32 %s266_s22, 4  ;;  %s3750_s23 = int_to_ptr.vmem [resolvable:$true] %s273_s23 }
   0xf   : > { %p3752_p8 = pnand %p3410_p6, %p38_p4  ;;  %s3757_s25 = scalar_lea.sflag [#allocation4], %s262_s16 }
  0x10   : > { %s3585_s26 = scalar_lea.hbm %s3748_s21, 4096  ;;  %s3590_s29 = scalar_lea.hbm %s5157_s0, 8192 }
  0x11   : > { %p3586_p10 = scmp.ne.s32.totalorder %s3748_s21, %s3585_s26  ;;  %p3587_p11 = pneg %p3752_p8 }
  0x12   : > { %p3591_p0 = scmp.lt.u32.totalorder %s3748_s21, %s5157_s0  ;;  %p3592_p1 = scmp.lt.u32.totalorder %s3590_s29, %s3585_s26 }
  0x13   : > { %p3588_p12 = pnand %p3587_p11, %p3586_p10  ;;  %p3594_p3 = scmp.lt.u32.totalorder %s3585_s26, %s3748_s21 }
  0x14   : > { %p3593_p2 = por %p3592_p1, %p3591_p0 }
  0x15   : > { %p3589_p13 = pneg %p3588_p12 }
  0x16   : > { %p3595_p4 = por %p3594_p3, %p3593_p2 }
  0x18   : > { %p3596_p5 = pnand %p3595_p4, %p3589_p13 }
  0x1a   : > { %3599 = shalt.err (!%p3596_p5)
}
  0x1b   : > { %s3600_s16 = scalar_lea.vmem %s3750_s23, 4096  ;;  %s3651_s17 = smov [#allocation3]  }
  0x1c   : > { %p3601_p6 = scmp.ne.s32.totalorder %s3750_s23, %s3600_s16  ;;  %s3605_s18 = sshll.u32 %s3651_s17, 4  ;;  %s3606_s18 = int_to_ptr.vmem [resolvable:$false] %s3605_s18 }
  0x1d   : > { %s3607_s19 = scalar_lea.vmem %s3606_s18, 8192  ;;  %p3608_p9 = scmp.lt.s32.totalorder %s3750_s23, %s3606_s18 }
  0x1e   : > { %p3603_p10 = pnand %p3601_p6, %p3587_p11  ;;  %p3609_p0 = scmp.lt.s32.totalorder %s3607_s19, %s3600_s16 }
  0x20   : > { %p3604_p12 = pneg %p3603_p10  ;;  %p3610_p1 = por %p3609_p0, %p3608_p9 }
  0x22   : > { %p3611_p2 = pnand %p3610_p1, %p3604_p12 }
  0x24   : > { %3614 = shalt.err (!%p3611_p2)
}
  0x25   : > { %s3652_s20 = smov 128   ;;  %s3653_s22 = smov 8  }
  0x26   : > { %3409 = dma.hbm_to_vmem [thread:$0]  (!%p3752_p8), %s3748_s21, 4096, %s3750_s23, %s3757_s25, %s3652_s20, %s3652_s20, %s3653_s22  }
  0x27   : > { %p290_p11 = scmp.lt.s32.totalorder %s3649_s10, 3  ;;  %p5169_p13 = scmp.ge.s32.totalorder %s3649_s10, 1 }
  0x29   : > { %p291_p3 = pnand %p5169_p13, %p290_p11 }
  0x2b   : > { %294 = sbr.rel (%p291_p3) target bundleno = 1581 (0x62d), region = 52 }
  0x32   : > { %s296_s26 = sand.u32 1, %s3641_s30  }
  0x33   : > { %s3200_s27 = sshll.u32 %s296_s26, 8  ;;  %s297_s28 = scalar_lea.sflag [#allocation4], %s296_s26 }
  0x34   : > { %s3789_s29 = scalar_lea.vmem [#allocation3], %s3200_s27 }
  0x35   : > { %3632 = dma.done.wait (%p3739_p7), %s297_s28, 4096  }
  0x36   : > { %3634 = vsyncadd (%p3739_p7), %s297_s28, 4294963200  ;;  %s3201_s24 = sshll.u32 %s3192_s7, 2  ;;  %vm363_vm0 = vcmask 64512   ;;  %v355_v0 = vld [vmem:[%s5159_s2] sm:$0xff]  ;;  %v886_v5 = vld [vmem:[%s5161_s4 + $0x8] sm:$0xff]  ;;  %v501_v31 = vlaneseq  ;;  %vm1165_vm1 = vcmask 523264  }
  0x37   : > { %p340_p8 = scmp.lt.s32.totalorder %s3201_s24, 7  ;;  %3268 = vmatprep.subr.mxu0 %v355_v0  ;;  %v885_v4 = vld [vmem:[%s5161_s4] sm:$0xff]  ;;  %v887_v6 = vld [vmem:[%s5161_s4 + $0x10] sm:$0xff]  ;;  %v888_v7 = vld [vmem:[%s5161_s4 + $0x18] sm:$0xff]  ;;  %v3654_v29 = vmov 1966171168  }
  0x38   : > { %3269 = vmatpush3.msra.mxu0 %v355_v0  ;;  %v3356_v8 = vpack.c.bf16 %v886_v5, %v885_v4  ;;  %v3360_v9 = vpack.c.bf16 %v888_v7, %v887_v6  ;;  %v889_v11 = vld [vmem:[%s5161_s4 + $0x20] sm:$0xff]  ;;  %v890_v12 = vld [vmem:[%s5161_s4 + $0x28] sm:$0xff]  ;;  %v891_v14 = vld [vmem:[%s5161_s4 + $0x30] sm:$0xff]  ;;  %v499_v30 = vunpack.c.l.s4 %v3654_v29  ;;  %v3861_v33 = vshrl.u32 %v501_v31, 7  ;;  %s1814_s19 = sld [smem:[#allocation2]] }
  0x39   : > { %s5177_s24 = smov (!%p340_p8, %s3201_s24), 7  ;;  %v3364_v13 = vpack.c.bf16 %v890_v12, %v889_v11  ;;  %v892_v15 = vld [vmem:[%s5161_s4 + $0x38] sm:$0xff]  ;;  %v893_v17 = vld [vmem:[%s5161_s4 + $0x40] sm:$0xff]  ;;  %v894_v18 = vld [vmem:[%s5161_s4 + $0x48] sm:$0xff]  ;;  %vm2010_vm2 = vcmask 1041409   ;;  %vm2012_vm3 = vcmask 1042434  }
  0x3a   : > { %s3202_s21 = sshll.u32 %s5177_s24, 3  ;;  %3357 = vmatprep.subr.bf16.mxu0 %v3356_v8  ;;  %3388 = vmatprep.subr.bf16.mxu1 %v3356_v8  ;;  %v3368_v16 = vpack.c.bf16 %v892_v15, %v891_v14  ;;  %v3372_v19 = vpack.c.bf16 %v894_v18, %v893_v17  ;;  %v895_v20 = vld [vmem:[%s5161_s4 + $0x50] sm:$0xff]  ;;  %v896_v21 = vld [vmem:[%s5161_s4 + $0x58] sm:$0xff]  ;;  %v897_v23 = vld [vmem:[%s5161_s4 + $0x60] sm:$0xff]  ;;  %v500_v32 = vunpack.c.0.s8 %v499_v30  ;;  %v3872_v46 = vsub.s32 0, %v3861_v33 }
  0x3b   : > { %s343_s12 = scalar_lea.vmem %s5158_s1, %s3202_s21  ;;  %3396 = vmatpush3.bf16.msra.mxu1 %v3356_v8  ;;  %v3376_v22 = vpack.c.bf16 %v896_v21, %v895_v20  ;;  %v898_v24 = vld [vmem:[%s5161_s4 + $0x68] sm:$0xff]  ;;  %v899_v26 = vld [vmem:[%s5161_s4 + $0x70] sm:$0xff]  ;;  %v900_v27 = vld [vmem:[%s5161_s4 + $0x78] sm:$0xff]  ;;  %vm2014_vm4 = vcmask 1043459   ;;  %vm2016_vm5 = vcmask 1044484   ;;  %vm2018_vm6 = vcmask 1045509   ;;  %s5086_s26 = scalar_lea.vmem %s5165_s8, %s3202_s21 }
  0x3c   : > { %v351_v1 = vld [vmem:[%s343_s12] sm:$0xff]  ;;  %v352_v2 = vld [vmem:[%s343_s12 + $0x8] sm:$0xff]  ;;  %v353_v3 = vld [vmem:[%s343_s12 + $0x10] sm:$0xff]  ;;  %3389 = vmatprep.subr.bf16.mxu1 %v3360_v9  ;;  %v3380_v25 = vpack.c.bf16 %v898_v24, %v897_v23  ;;  %v3384_v28 = vpack.c.bf16 %v900_v27, %v899_v26  ;;  %v3867_v36 = vsub.s32 %v500_v32, %v3861_v33  ;;  %vm2020_vm7 = vcmask 1046534  }
  0x3d   : > { %3270 = vmatprep.mubr.msk.f32.mxu0 %vm363_vm0, %v351_v1  ;;  %v354_v10 = vld [vmem:[%s343_s12 + $0x18] sm:$0xff]  ;;  %v3205_v34 = vld [vmem:[%s5160_s3] ss:$0 sm:$0xff]  ;;  %v462_v54 = vld [vmem:[%s3789_s29 + $0x8] sm:$0xff]  ;;  %vm2022_vm8 = vcmask 1047559  }
  0x3e   : > { %3271 = vmatmul.mubr.msk.f32.vlgmr.msra.gmra.mrb[0].mxu0 %vm363_vm0, %v352_v2  ;;  %v461_v58 = vld [vmem:[%s3789_s29] sm:$0xff]  ;;  %v463_v60 = vld [vmem:[%s3789_s29 + $0x10] sm:$0xff]  ;;  %v464_v15 = vld [vmem:[%s3789_s29 + $0x18] sm:$0xff] }
  0x3f   : > { %3273 = vmatprep.mubr.msk.f32.mxu0 %vm363_vm0, %v353_v3  ;;  %3359 = vmatpush3.bf16.msra.mxu0 %v3356_v8  ;;  %v476_v20 = vld [vmem:[%s3789_s29 + $0x78] sm:$0xff]  ;;  %v475_v27 = vld [vmem:[%s3789_s29 + $0x70] sm:$0xff] }
  0x40   : > { %3361 = vmatprep.subr.bf16.mxu0 %v3360_v9  ;;  %3397 = vmatpush3.bf16.msra.mxu1 %v3360_v9 }
  0x41   : > { %3390 = vmatprep.subr.bf16.mxu1 %v3364_v13 }
  0x42   : > { %3274 = vmatmul.mubr.msk.f32.gmra.mrb[2].mxu0 %vm363_vm0, %v354_v10 }
  0x43   : > { %3363 = vmatpush3.bf16.msra.mxu0 %v3360_v9 }
  0x44   : > { %3365 = vmatprep.subr.bf16.mxu0 %v3364_v13  ;;  %3398 = vmatpush3.bf16.msra.mxu1 %v3364_v13 }
  0x45   : > { %3391 = vmatprep.subr.bf16.mxu1 %v3368_v16 }
  0x47   : > { %3367 = vmatpush3.bf16.msra.mxu0 %v3364_v13 }
  0x48   : > { %3369 = vmatprep.subr.bf16.mxu0 %v3368_v16  ;;  %3399 = vmatpush3.bf16.msra.mxu1 %v3368_v16 }
  0x49   : > { %3392 = vmatprep.subr.bf16.mxu1 %v3372_v19 }
  0x4b   : > { %3371 = vmatpush3.bf16.msra.mxu0 %v3368_v16  ;;  %v465_v16 = vld [vmem:[%s3789_s29 + $0x20] sm:$0xff] }
  0x4c   : > { %3373 = vmatprep.subr.bf16.mxu0 %v3372_v19  ;;  %3400 = vmatpush3.bf16.msra.mxu1 %v3372_v19 }
  0x4d   : > { %3393 = vmatprep.subr.bf16.mxu1 %v3376_v22 }
  0x4f   : > { %3375 = vmatpush3.bf16.msra.mxu0 %v3372_v19 }
  0x50   : > { %3377 = vmatprep.subr.bf16.mxu0 %v3376_v22  ;;  %3401 = vmatpush3.bf16.msra.mxu1 %v3376_v22 }
  0x51   : > { %3394 = vmatprep.subr.bf16.mxu1 %v3380_v25 }
  0x53   : > { %3379 = vmatpush3.bf16.msra.mxu0 %v3376_v22 }
  0x54   : > { %3381 = vmatprep.subr.bf16.mxu0 %v3380_v25  ;;  %3402 = vmatpush3.bf16.msra.mxu1 %v3380_v25 }
  0x55   : > { %3395 = vmatprep.subr.bf16.mxu1 %v3384_v28 }
  0x57   : > { %3383 = vmatpush3.bf16.msra.mxu0 %v3380_v25 }
  0x58   : > { %3385 = vmatprep.subr.bf16.mxu0 %v3384_v28  ;;  %3403 = vmatpush3.bf16.msra.mxu1 %v3384_v28 }
  0x5b   : > { %3387 = vmatpush3.bf16.msra.mxu0 %v3384_v28  ;;  %v477_v28 = vld [vmem:[%s3789_s29 + $0x80] sm:$0xff] }
 0x111   : > { %v3272_v35 = vpop.f32.mrb[0].mxu0 }
 0x112   : > { %v448_v37 = vadd.f32 %v3272_v35, %v3205_v34  ;;  %v442_v38 = vpop.f32.mrb[1].mxu0 }
 0x113   : > { %v443_v39 = vadd.f32 %v3205_v34, %v442_v38 }
 0x114   : > { %v546_v40 = vcombine.high %v448_v37, %v448_v37  ;;  %v553_v0 = vrot.slane %v448_v37, %v3867_v36 }
 0x115   : > { %v497_v41 = vcombine.high %v443_v39, %v443_v39  ;;  %v504_v42 = vrot.slane %v443_v39, %v3867_v36  ;;  %v3275_v43 = vpop.f32.mrb[2].mxu0  ;;  %v466_v39 = vld [vmem:[%s3789_s29 + $0x28] sm:$0xff] }
 0x116   : > { %v560_v44 = vrot.slane %v546_v40, %v3867_v36  ;;  %v452_v45 = vpop.f32.mrb[3].mxu0  ;;  %v561_v13 = vcombine.high %v553_v0, %v553_v0  ;;  %v569_v24 = vrot.slane %v553_v0, %v3867_v36  ;;  %v3908_v25 = vadd.f32 %v3275_v43, %v3205_v34  ;;  %v480_v0 = vld [vmem:[%s3789_s29 + $0x98] sm:$0xff] }
 0x117   : > { %v512_v47 = vcombine.high %v504_v42, %v504_v42  ;;  %v520_v48 = vrot.slane %v504_v42, %v3867_v36  ;;  %v453_v49 = vadd.f32 %v3205_v34, %v452_v45  ;;  %v511_v51 = vrot.slane %v497_v41, %v3867_v36  ;;  %v478_v45 = vld [vmem:[%s3789_s29 + $0x88] sm:$0xff] }
 0x118   : > { %v562_v50 = vcombine.high %v560_v44, %v560_v44  ;;  %v3893_v9 = vrot.slane %v560_v44, %v3867_v36 }
 0x119   : > { %v534_v52 = vrot.slane %v512_v47, %v3867_v36  ;;  %v542_v53 = vcombine.high %v520_v48, %v520_v48  ;;  %v595_v55 = vcombine.high %v453_v49, %v453_v49  ;;  %v602_v57 = vrot.slane %v453_v49, %v3867_v36  ;;  %v467_v47 = vld [vmem:[%s3789_s29 + $0x30] sm:$0xff] }
 0x11a   : > { %v696_v59 = vrot.slane %v520_v48, %v3872_v46  ;;  %v3885_v62 = vrot.slane %v562_v50, %v3867_v36  ;;  %v527_v63 = vrot.slane %v511_v51, %v3867_v36  ;;  %v513_v1 = vcombine.high %v511_v51, %v511_v51  ;;  %v479_v51 = vld [vmem:[%s3789_s29 + $0x90] sm:$0xff] }
 0x11b   : > { %v700_v56 = vrot.slane %v534_v52, %v3872_v46  ;;  %v704_v61 = vrot.slane %v542_v53, %v3872_v46  ;;  %v610_v3 = vcombine.high %v602_v57, %v602_v57  ;;  %v618_v4 = vrot.slane %v602_v57, %v3867_v36 }
 0x11c   : > { %v853_v5 = vadd.f32 %v696_v59, %v461_v58  ;;  %v609_v7 = vrot.slane %v595_v55, %v3867_v36  ;;  %v594_v10 = vcombine.high %v3885_v62, %v3885_v62  ;;  %v544_v11 = vcombine.high %v534_v52, %v534_v52  ;;  %v468_v59 = vld [vmem:[%s3789_s29 + $0x38] sm:$0xff] }
 0x11d   : > { %v854_v2 = vadd.f32 %v700_v56, %v462_v54  ;;  %v855_v6 = vadd.f32 %v704_v61, %v463_v60  ;;  %v632_v8 = vrot.slane %v610_v3, %v3867_v36  ;;  %v712_v12 = vrot.slane %v527_v63, %v3872_v46  ;;  %v469_v60 = vld [vmem:[%s3789_s29 + $0x40] sm:$0xff] }
 0x11e   : > { %3308 = vmatprep.mubr.f32.mxu0 %v853_v5  ;;  %v640_v14 = vcombine.high %v618_v4, %v618_v4  ;;  %v541_v17 = vrot.slane %v513_v1, %v3867_v36  ;;  %v543_v18 = vcombine.high %v527_v63, %v527_v63  ;;  %v592_v19 = vcombine.high %v3893_v9, %v3893_v9  ;;  %v481_v3 = vld [vmem:[%s3789_s29 + $0xa0] sm:$0xff] }
 0x11f   : > { %3309 = vmatmul.mubr.f32.vlgmr.msra.gmra.mrb[4].mxu0 %v854_v2  ;;  %v756_v21 = vrot.slane %v594_v10, %v3872_v46  ;;  %v708_v22 = vrot.slane %v544_v11, %v3872_v46  ;;  %v760_v23 = vrot.slane %v618_v4, %v3872_v46  ;;  %v611_v26 = vcombine.high %v609_v7, %v609_v7  ;;  %v470_v11 = vld [vmem:[%s3789_s29 + $0x48] sm:$0xff] }
 0x120   : > { %3311 = vmatprep.mubr.f32.mxu0 %v855_v6  ;;  %v764_v29 = vrot.slane %v632_v8, %v3872_v46  ;;  %v752_v30 = vrot.slane %v592_v19, %v3872_v46  ;;  %v857_v35 = vadd.f32 %v712_v12, %v465_v16  ;;  %v716_v37 = vrot.slane %v541_v17, %v3872_v46  ;;  %v482_v16 = vld [vmem:[%s3789_s29 + $0xa8] sm:$0xff] }
 0x121   : > { %v856_v32 = vadd.f32 %v708_v22, %v464_v15  ;;  %v868_v38 = vadd.f32 %v756_v21, %v476_v20  ;;  %v720_v40 = vrot.slane %v543_v18, %v3872_v46  ;;  %v642_v34 = vcombine.high %v632_v8, %v632_v8  ;;  %v483_v21 = vld [vmem:[%s3789_s29 + $0xb0] sm:$0xff] }
 0x122   : > { %v545_v41 = vcombine.high %v541_v17, %v541_v17  ;;  %v625_v42 = vrot.slane %v609_v7, %v3867_v36  ;;  %v867_v43 = vadd.f32 %v752_v30, %v475_v27  ;;  %v869_v44 = vadd.f32 %v760_v23, %v477_v28  ;;  %v471_v17 = vld [vmem:[%s3789_s29 + $0x50] sm:$0xff]  ;;  %v472_v28 = vld [vmem:[%s3789_s29 + $0x58] sm:$0xff] }
 0x123   : > { %3312 = vmatmul.mubr.f32.gmra.mrb[6].mxu0 %v856_v32  ;;  %v768_v48 = vrot.slane %v640_v14, %v3872_v46  ;;  %v583_v49 = vrot.slane %v561_v13, %v3867_v36  ;;  %v591_v50 = vcombine.high %v569_v24, %v569_v24  ;;  %v651_v52 = vrot.slane %v3908_v25, %v3867_v36  ;;  %v484_v30 = vld [vmem:[%s3789_s29 + $0xb8] sm:$0xff] }
 0x124   : > { %3314 = vmatprep.mubr.f32.mxu0 %v857_v35  ;;  %3329 = vmatprep.mubr.f32.mxu1 %v867_v43  ;;  %v858_v53 = vadd.f32 %v716_v37, %v466_v39  ;;  %v724_v54 = vrot.slane %v545_v41, %v3872_v46  ;;  %v728_v55 = vrot.slane %v569_v24, %v3872_v46  ;;  %v473_v35 = vld [vmem:[%s3789_s29 + $0x60] sm:$0xff]  ;;  %v474_v43 = vld [vmem:[%s3789_s29 + $0x68] sm:$0xff] }
 0x125   : > { %3330 = vmatmul.mubr.f32.vlgmr.msra.gmra.mrb[0].mxu1 %v868_v38  ;;  %v870_v56 = vadd.f32 %v764_v29, %v478_v45  ;;  %v859_v57 = vadd.f32 %v720_v40, %v467_v47  ;;  %v772_v58 = vrot.slane %v642_v34, %v3872_v46  ;;  %v639_v61 = vrot.slane %v611_v26, %v3867_v36  ;;  %v485_v39 = vld [vmem:[%s3789_s29 + $0xc0] sm:$0xff] }
 0x126   : > { %3332 = vmatprep.mubr.f32.mxu1 %v869_v44  ;;  %v871_v63 = vadd.f32 %v768_v48, %v479_v51  ;;  %v776_v1 = vrot.slane %v625_v42, %v3872_v46  ;;  %v641_v2 = vcombine.high %v625_v42, %v625_v42  ;;  %v860_v4 = vadd.f32 %v724_v54, %v468_v59 }
 0x127   : > { %3315 = vmatmul.mubr.f32.gmra.mrb[8].mxu0 %v858_v53  ;;  %v861_v5 = vadd.f32 %v728_v55, %v469_v60  ;;  %v732_v6 = vrot.slane %v583_v49, %v3872_v46  ;;  %v593_v7 = vcombine.high %v583_v49, %v583_v49  ;;  %v872_v8 = vadd.f32 %v772_v58, %v480_v0  ;;  %v489_v60 = vld [vmem:[%s3789_s29 + $0xe0] sm:$0xff] }
 0x128   : > { %3317 = vmatprep.mubr.f32.mxu0 %v859_v57  ;;  %v780_v10 = vrot.slane %v639_v61, %v3872_v46  ;;  %v736_v12 = vrot.slane %v591_v50, %v3872_v46  ;;  %v643_v13 = vcombine.high %v639_v61, %v639_v61  ;;  %v667_v14 = vrot.slane %v651_v52, %v3867_v36  ;;  %v486_v50 = vld [vmem:[%s3789_s29 + $0xc8] sm:$0xff]  ;;  %v488_v57 = vld [vmem:[%s3789_s29 + $0xd8] sm:$0xff] }
 0x129   : > { %3333 = vmatmul.mubr.f32.gmra.mrb[2].mxu1 %v870_v56  ;;  %v873_v15 = vadd.f32 %v776_v1, %v481_v3  ;;  %v784_v18 = vrot.slane %v641_v2, %v3872_v46  ;;  %v644_v19 = vcombine.high %v3908_v25, %v3908_v25  ;;  %v659_v20 = vcombine.high %v651_v52, %v651_v52  ;;  %v487_v52 = vld [vmem:[%s3789_s29 + $0xd0] sm:$0xff]  ;;  %v490_v2 = vld [vmem:[%s3789_s29 + $0xe8] sm:$0xff] }
 0x12a   : > { %3335 = vmatprep.mubr.f32.mxu1 %v871_v63  ;;  %v862_v22 = vadd.f32 %v732_v6, %v470_v11  ;;  %v740_v23 = vrot.slane %v593_v7, %v3872_v46  ;;  %v874_v24 = vadd.f32 %v780_v10, %v482_v16  ;;  %v863_v26 = vadd.f32 %v736_v12, %v471_v17  ;;  %v492_v7 = vld [vmem:[%s3789_s29 + $0xf8] sm:$0xff]  ;;  %v3978_v10 = vld [vmem:[%s5162_s5] ss:$0 sm:$0xff] }
 0x12b   : > { %3318 = vmatmul.mubr.f32.gmra.mrb[10].mxu0 %v860_v4  ;;  %v788_v27 = vrot.slane %v643_v13, %v3872_v46  ;;  %v744_v29 = vrot.slane %v3893_v9, %v3872_v46  ;;  %v875_v25 = vadd.f32 %v784_v18, %v483_v21  ;;  %v792_v32 = vrot.slane %v667_v14, %v3872_v46  ;;  %v491_v4 = vld [vmem:[%s3789_s29 + $0xf0] sm:$0xff] }
 0x12c   : > { %3320 = vmatprep.mubr.f32.mxu0 %v861_v5  ;;  %v658_v37 = vrot.slane %v644_v19, %v3867_v36  ;;  %v681_v38 = vrot.slane %v659_v20, %v3867_v36  ;;  %v689_v40 = vcombine.high %v667_v14, %v667_v14  ;;  %v864_v34 = vadd.f32 %v740_v23, %v472_v28 }
 0x12d   : > { %3336 = vmatmul.mubr.f32.gmra.mrb[4].mxu1 %v872_v8  ;;  %v748_v9 = vrot.slane %v3885_v62, %v3872_v46  ;;  %v876_v41 = vadd.f32 %v788_v27, %v484_v30  ;;  %v865_v42 = vadd.f32 %v744_v29, %v473_v35  ;;  %v877_v44 = vadd.f32 %v792_v32, %v485_v39 }
 0x12e   : > { %3338 = vmatprep.mubr.f32.mxu1 %v873_v15  ;;  %v660_v45 = vcombine.high %v658_v37, %v658_v37  ;;  %v796_v47 = vrot.slane %v681_v38, %v3872_v46  ;;  %v691_v48 = vcombine.high %v681_v38, %v681_v38  ;;  %v674_v49 = vrot.slane %v658_v37, %v3867_v36 }
 0x12f   : > { %3321 = vmatmul.mubr.f32.gmra.mrb[12].mxu0 %v862_v22  ;;  %v866_v51 = vadd.f32 %v748_v9, %v474_v43  ;;  %v800_v62 = vrot.slane %v689_v40, %v3872_v46 }
 0x130   : > { %3323 = vmatprep.mubr.f32.mxu0 %v863_v26  ;;  %v878_v53 = vadd.f32 %v796_v47, %v486_v50  ;;  %v804_v54 = vrot.slane %v691_v48, %v3872_v46  ;;  %v688_v55 = vrot.slane %v660_v45, %v3867_v36  ;;  %v808_v58 = vrot.slane %v674_v49, %v3872_v46 }
 0x131   : > { %3339 = vmatmul.mubr.f32.gmra.mrb[6].mxu1 %v874_v24  ;;  %v879_v56 = vadd.f32 %v800_v62, %v487_v52  ;;  %v690_v59 = vcombine.high %v674_v49, %v674_v49 }
 0x132   : > { %3341 = vmatprep.mubr.f32.mxu1 %v875_v25  ;;  %v880_v61 = vadd.f32 %v804_v54, %v488_v57  ;;  %v812_v63 = vrot.slane %v688_v55, %v3872_v46  ;;  %v692_v0 = vcombine.high %v688_v55, %v688_v55  ;;  %v881_v1 = vadd.f32 %v808_v58, %v489_v60 }
 0x133   : > { %3324 = vmatmul.mubr.f32.gmra.mrb[14].mxu0 %v864_v34  ;;  %v816_v3 = vrot.slane %v690_v59, %v3872_v46 }
 0x134   : > { %3326 = vmatprep.mubr.f32.mxu0 %v865_v42  ;;  %v882_v36 = vadd.f32 %v812_v63, %v490_v2  ;;  %v820_v5 = vrot.slane %v692_v0, %v3872_v46 }
 0x135   : > { %3342 = vmatmul.mubr.f32.gmra.mrb[8].mxu1 %v876_v41  ;;  %v883_v6 = vadd.f32 %v816_v3, %v491_v4 }
 0x136   : > { %3344 = vmatprep.mubr.f32.mxu1 %v877_v44  ;;  %v884_v8 = vadd.f32 %v820_v5, %v492_v7 }
 0x137   : > { %3327 = vmatmul.mubr.f32.gmra.mrb[16].mxu0 %v866_v51 }
 0x139   : > { %3345 = vmatmul.mubr.f32.gmra.mrb[10].mxu1 %v878_v53 }
 0x13a   : > { %3347 = vmatprep.mubr.f32.mxu1 %v879_v56 }
 0x13d   : > { %3348 = vmatmul.mubr.f32.gmra.mrb[12].mxu1 %v880_v61 }
 0x13e   : > { %3350 = vmatprep.mubr.f32.mxu1 %v881_v1 }
 0x141   : > { %3351 = vmatmul.mubr.f32.gmra.mrb[14].mxu1 %v882_v36 }
 0x142   : > { %3353 = vmatprep.mubr.f32.mxu1 %v883_v6 }
 0x145   : > { %3354 = vmatmul.mubr.f32.gmra.mrb[16].mxu1 %v884_v8 }
 0x1f2   : > { %v3310_v11 = vpop.f32.mrb[4].mxu0 }
 0x1f3   : > { %v980_v12 = vadd.f32 %v3310_v11, %v3978_v10  ;;  %v974_v13 = vpop.f32.mrb[5].mxu0 }
 0x1f4   : > { %v975_v14 = vadd.f32 %v3978_v10, %v974_v13 }
 0x1f5   : > { %v3982_v15 = vmax.f32 %v980_v12, 0.0 }
 0x1f6   : > { %v3984_v16 = vmax.f32 %v975_v14, 0.0  ;;  %v3313_v17 = vpop.f32.mrb[6].mxu0 }
 0x1f7   : > { %v1169_v18 = vsel %vm1165_vm1, %v3982_v15, 0.0  ;;  %v990_v19 = vadd.f32 %v3313_v17, %v3978_v10  ;;  %v984_v20 = vpop.f32.mrb[7].mxu0  ;;  %v1296_v25 = vmul.f32 %v3982_v15, %v3982_v15 }
 0x1f8   : > { %1170 = vadd.xlane.f32.xlu0 %v1169_v18  ;;  %v1295_v21 = vmul.f32 %v3984_v16, %v3984_v16  ;;  %v3331_v22 = vpop.f32.mrb[0].mxu1  ;;  %v1166_v29 = vsel %vm1165_vm1, %v3984_v16, 0.0  ;;  %v985_v37 = vadd.f32 %v3978_v10, %v984_v20 }
 0x1f9   : > { %v3991_v23 = vmax.f32 %v990_v19, 0.0  ;;  %v1050_v26 = vadd.f32 %v3331_v22, %v3978_v10  ;;  %v1044_v27 = vpop.f32.mrb[1].mxu1  ;;  %v1330_v9 = vsel %vm1165_vm1, %v1296_v25, 0.0 }
 0x1fa   : > { %v1327_v24 = vsel %vm1165_vm1, %v1295_v21, 0.0  ;;  %v3316_v28 = vpop.f32.mrb[8].mxu0  ;;  %v1045_v30 = vadd.f32 %v3978_v10, %v1044_v27  ;;  %v4012_v43 = vmax.f32 %v985_v37, 0.0 }
 0x1fb   : > { %1328 = vadd.xlane.f32.xlu1 %v1327_v24  ;;  %v994_v32 = vpop.f32.mrb[9].mxu0  ;;  %v1175_v38 = vsel %vm1165_vm1, %v3991_v23, 0.0  ;;  %v4005_v40 = vmax.f32 %v1050_v26, 0.0  ;;  %v1298_v55 = vmul.f32 %v3991_v23, %v3991_v23  ;;  %v1000_v1 = vadd.f32 %v3316_v28, %v3978_v10 }
 0x1fc   : > { %1167 = vadd.xlane.f32.xlu0 %v1166_v29  ;;  %v4000_v35 = vmax.f32 %v1045_v30, 0.0  ;;  %v3334_v39 = vpop.f32.mrb[2].mxu1  ;;  %v1172_v54 = vsel %vm1165_vm1, %v4012_v43, 0.0  ;;  %v995_v18 = vadd.f32 %v3978_v10, %v994_v32  ;;  %v1297_v26 = vmul.f32 %v4012_v43, %v4012_v43 }
 0x1fd   : > { %v1054_v41 = vpop.f32.mrb[3].mxu1  ;;  %v1211_v49 = vsel %vm1165_vm1, %v4005_v40, 0.0  ;;  %v1310_v50 = vmul.f32 %v4005_v40, %v4005_v40  ;;  %v1060_v56 = vadd.f32 %v3334_v39, %v3978_v10  ;;  %v1336_v4 = vsel %vm1165_vm1, %v1298_v55, 0.0 }
 0x1fe   : > { %v4007_v34 = vpop.f32.mrb[10].mxu0  ;;  %v1208_v45 = vsel %vm1165_vm1, %v4000_v35, 0.0  ;;  %v1055_v52 = vadd.f32 %v3978_v10, %v1054_v41  ;;  %v1309_v60 = vmul.f32 %v4000_v35, %v4000_v35  ;;  %v4065_v17 = vmax.f32 %v1000_v1, 0.0 }
 0x1ff   : > { %1176 = vadd.xlane.f32.xlu1 %v1175_v38  ;;  %v4010_v42 = vpop.f32.mrb[11].mxu0  ;;  %v1372_v59 = vsel %vm1165_vm1, %v1310_v50, 0.0  ;;  %v4050_v36 = vmax.f32 %v1060_v56, 0.0  ;;  %v4080_v28 = vmax.f32 %v995_v18, 0.0  ;;  %v1333_v37 = vsel %vm1165_vm1, %v1297_v26, 0.0 }
 0x200   : > { %1331 = vadd.xlane.f32.xlu0 %v1330_v9  ;;  %v3337_v44 = vpop.f32.mrb[4].mxu1  ;;  %v4047_v2 = vmax.f32 %v1055_v52, 0.0  ;;  %v1369_v8 = vsel %vm1165_vm1, %v1309_v60, 0.0  ;;  %v1181_v25 = vsel %vm1165_vm1, %v4065_v17, 0.0  ;;  %v1010_v50 = vadd.f32 %v4007_v34, %v3978_v10 }
 0x201   : > { %v4018_v48 = vpop.f32.mrb[5].mxu1  ;;  %v1217_v24 = vsel %vm1165_vm1, %v4050_v36, 0.0  ;;  %v1312_v38 = vmul.f32 %v4050_v36, %v4050_v36  ;;  %v1070_v9 = vadd.f32 %v3337_v44, %v3978_v10  ;;  %v1300_v44 = vmul.f32 %v4065_v17, %v4065_v17 }
 0x202   : > { %v4016_v47 = vpop.f32.mrb[12].mxu0  ;;  %v1214_v20 = vsel %vm1165_vm1, %v4047_v2, 0.0  ;;  %v4112_v34 = vmax.f32 %v1010_v50, 0.0 }
 0x203   : > { %1209 = vadd.xlane.f32.xlu1 %v1208_v45  ;;  %v1014_v51 = vpop.f32.mrb[13].mxu0  ;;  %v1178_v45 = vsel %vm1165_vm1, %v4080_v28, 0.0  ;;  %v4109_v56 = vmax.f32 %v1070_v9, 0.0  ;;  %v1342_v1 = vsel %vm1165_vm1, %v1300_v44, 0.0 }
 0x204   : > { %1212 = vadd.xlane.f32.xlu0 %v1211_v49  ;;  %v4025_v62 = vadd.f32 %v3978_v10, %v1014_v51  ;;  %v4028_v53 = vpop.f32.mrb[6].mxu1  ;;  %v1311_v49 = vmul.f32 %v4047_v2, %v4047_v2 }
 0x205   : > { %v1074_v58 = vpop.f32.mrb[7].mxu1  ;;  %v1314_v18 = vmul.f32 %v4109_v56, %v4109_v56 }
 0x206   : > { %v4035_v57 = vpop.f32.mrb[14].mxu0  ;;  %v4041_v61 = vadd.f32 %v3978_v10, %v1074_v58 }
 0x207   : > { %1173 = vadd.xlane.f32.xlu1 %v1172_v54  ;;  %v1024_v63 = vpop.f32.mrb[15].mxu0  ;;  %v1378_v54 = vsel %vm1165_vm1, %v1312_v38, 0.0 }
 0x208   : > { %1373 = vadd.xlane.f32.xlu0 %v1372_v59  ;;  %v4044_v0 = vadd.f32 %v3978_v10, %v1024_v63  ;;  %v3343_v3 = vpop.f32.mrb[8].mxu1  ;;  %v1375_v59 = vsel %vm1165_vm1, %v1311_v49, 0.0  ;;  %v4176_v44 = vmax.f32 %v4041_v61, 0.0 }
 0x209   : > { %v4053_v5 = vadd.f32 %v3343_v3, %v3978_v10  ;;  %v1084_v6 = vpop.f32.mrb[9].mxu1 }
 0x20a   : > { %v3328_v7 = vpop.f32.mrb[16].mxu0  ;;  %v4057_v11 = vadd.f32 %v3978_v10, %v1084_v6  ;;  %v1223_v6 = vsel %vm1165_vm1, %v4109_v56, 0.0 }
 0x20b   : > { %1337 = vadd.xlane.f32.xlu1 %v1336_v4  ;;  %v4060_v12 = vadd.f32 %v3328_v7, %v3978_v10  ;;  %v1034_v13 = vpop.f32.mrb[17].mxu0  ;;  %v1065_v4 = vadd.f32 %v3978_v10, %v4018_v48  ;;  %v1299_v7 = vmul.f32 %v4080_v28, %v4080_v28  ;;  %v1005_v48 = vadd.f32 %v3978_v10, %v4010_v42 }
 0x20c   : > { %1370 = vadd.xlane.f32.xlu0 %v1369_v8  ;;  %v4063_v14 = vadd.f32 %v3978_v10, %v1034_v13  ;;  %v3346_v19 = vpop.f32.mrb[10].mxu1  ;;  %v1080_v8 = vadd.f32 %v4028_v53, %v3978_v10  ;;  %v1187_v13 = vsel %vm1165_vm1, %v4112_v34, 0.0  ;;  %v1384_v53 = vsel %vm1165_vm1, %v1314_v18, 0.0 }
 0x20d   : > { %v4071_v21 = vadd.f32 %v3346_v19, %v3978_v10  ;;  %v1094_v22 = vpop.f32.mrb[11].mxu1  ;;  %v4135_v19 = vmax.f32 %v1065_v4, 0.0  ;;  %v4143_v26 = vmax.f32 %v1005_v48, 0.0  ;;  %v1315_v18 = vmul.f32 %v4176_v44, %v4176_v44 }
 0x20e   : > { %v4078_v27 = vadd.f32 %v3978_v10, %v1094_v22  ;;  %v1020_v22 = vadd.f32 %v4016_v47, %v3978_v10  ;;  %v4203_v48 = vmax.f32 %v4060_v12, 0.0  ;;  %v4216_v12 = vmax.f32 %v4053_v5, 0.0 }
 0x20f   : > { %1215 = vadd.xlane.f32.xlu1 %v1214_v20  ;;  %v1339_v20 = vsel %vm1165_vm1, %v1299_v7, 0.0  ;;  %v1184_v47 = vsel %vm1165_vm1, %v4143_v26, 0.0 }
 0x210   : > { %1218 = vadd.xlane.f32.xlu0 %v1217_v24  ;;  %v3349_v29 = vpop.f32.mrb[12].mxu1  ;;  %v4140_v24 = vmax.f32 %v1080_v8, 0.0  ;;  %v4196_v8 = vmax.f32 %v4078_v27, 0.0  ;;  %v1387_v27 = vsel %vm1165_vm1, %v1315_v18, 0.0 }
 0x211   : > { %v4085_v30 = vadd.f32 %v3349_v29, %v3978_v10  ;;  %v1104_v32 = vpop.f32.mrb[13].mxu1  ;;  %v1220_v29 = vsel %vm1165_vm1, %v4135_v19, 0.0 }
 0x212   : > { %v4091_v39 = vadd.f32 %v3978_v10, %v1104_v32  ;;  %v1229_v42 = vsel %vm1165_vm1, %v4140_v24, 0.0  ;;  %v1313_v32 = vmul.f32 %v4135_v19, %v4135_v19  ;;  %v1316_v7 = vmul.f32 %v4140_v24, %v4140_v24 }
 0x213   : > { %1182 = vadd.xlane.f32.xlu1 %v1181_v25  ;;  %v4147_v25 = vmax.f32 %v1020_v22, 0.0 }
 0x214   : > { %1334 = vadd.xlane.f32.xlu0 %v1333_v37  ;;  %v3352_v41 = vpop.f32.mrb[14].mxu1  ;;  %v1030_v37 = vadd.f32 %v4035_v57, %v3978_v10  ;;  %v1301_v57 = vmul.f32 %v4143_v26, %v4143_v26 }
 0x215   : > { %v4101_v51 = vadd.f32 %v3352_v41, %v3978_v10  ;;  %v1114_v52 = vpop.f32.mrb[15].mxu1  ;;  %v1193_v38 = vsel %vm1165_vm1, %v4147_v25, 0.0  ;;  %v1304_v9 = vmul.f32 %v4147_v25, %v4147_v25  ;;  %v1381_v41 = vsel %vm1165_vm1, %v1313_v32, 0.0 }
 0x216   : > { %v4107_v55 = vadd.f32 %v3978_v10, %v1114_v52  ;;  %v4164_v49 = vmax.f32 %v1030_v37, 0.0  ;;  %v4171_v52 = vmax.f32 %v4044_v0, 0.0  ;;  %v4184_v0 = vmax.f32 %v4025_v62, 0.0 }
 0x217   : > { %1179 = vadd.xlane.f32.xlu1 %v1178_v45  ;;  %v1302_v45 = vmul.f32 %v4112_v34, %v4112_v34  ;;  %v1354_v50 = vsel %vm1165_vm1, %v1304_v9, 0.0  ;;  %v1319_v32 = vmul.f32 %v4196_v8, %v4196_v8  ;;  %v1235_v37 = vsel %vm1165_vm1, %v4216_v12, 0.0 }
 0x218   : > { %1379 = vadd.xlane.f32.xlu0 %v1378_v54  ;;  %v3355_v58 = vpop.f32.mrb[16].mxu1  ;;  %v1199_v54 = vsel %vm1165_vm1, %v4164_v49, 0.0  ;;  %v1305_v4 = vmul.f32 %v4171_v52, %v4171_v52  ;;  %v1303_v22 = vmul.f32 %v4184_v0, %v4184_v0 }
 0x219   : > { %v4115_v60 = vadd.f32 %v3355_v58, %v3978_v10  ;;  %v1124_v63 = vpop.f32.mrb[17].mxu1  ;;  %v1345_v58 = vsel %vm1165_vm1, %v1301_v57, 0.0  ;;  %v1399_v5 = vsel %vm1165_vm1, %v1319_v32, 0.0  ;;  %v4243_v57 = vmax.f32 %v4091_v39, 0.0 }
 0x21a   : > { %v4119_v3 = vadd.f32 %v3978_v10, %v1124_v63  ;;  %v1348_v10 = vsel %vm1165_vm1, %v1302_v45, 0.0  ;;  %v1306_v63 = vmul.f32 %v4164_v49, %v4164_v49  ;;  %v1357_v62 = vsel %vm1165_vm1, %v1305_v4, 0.0 }
 0x21b   : > { %1376 = vadd.xlane.f32.xlu1 %v1375_v59  ;;  %v1196_v59 = vsel %vm1165_vm1, %v4171_v52, 0.0  ;;  %v4236_v45 = vmax.f32 %v4085_v30, 0.0  ;;  %v4248_v30 = vmax.f32 %v4071_v21, 0.0  ;;  %v1321_v18 = vmul.f32 %v4243_v57, %v4243_v57 }
 0x21c   : > { %1343 = vadd.xlane.f32.xlu0 %v1342_v1  ;;  %v1226_v1 = vsel %vm1165_vm1, %v4176_v44, 0.0  ;;  %v1360_v61 = vsel %vm1165_vm1, %v1306_v63, 0.0 }
 0x21d   : > { %v1322_v63 = vmul.f32 %v4236_v45, %v4236_v45  ;;  %v1241_v39 = vsel %vm1165_vm1, %v4248_v30, 0.0 }
 0x21f   : > { %1224 = vadd.xlane.f32.xlu1 %v1223_v6  ;;  %v1190_v6 = vsel %vm1165_vm1, %v4184_v0, 0.0  ;;  %v1408_v21 = vsel %vm1165_vm1, %v1322_v63, 0.0 }
 0x220   : > { %1188 = vadd.xlane.f32.xlu0 %v1187_v13  ;;  %v1390_v13 = vsel %vm1165_vm1, %v1316_v7, 0.0  ;;  %v4267_v7 = vmax.f32 %v4107_v55, 0.0 }
 0x222   : > { %v1323_v55 = vmul.f32 %v4267_v7, %v4267_v7 }
 0x223   : > { %1340 = vadd.xlane.f32.xlu1 %v1339_v20  ;;  %v1238_v20 = vsel %vm1165_vm1, %v4196_v8, 0.0 }
 0x224   : > { %1385 = vadd.xlane.f32.xlu0 %v1384_v53  ;;  %v4211_v53 = vmax.f32 %v4063_v14, 0.0  ;;  %v4224_v14 = vmax.f32 %v4057_v11, 0.0 }
 0x226   : > { %v1232_v9 = vsel %vm1165_vm1, %v4224_v14, 0.0 }
 0x227   : > { %1221 = vadd.xlane.f32.xlu1 %v1220_v29  ;;  %v1205_v29 = vsel %vm1165_vm1, %v4203_v48, 0.0 }
 0x228   : > { %1230 = vadd.xlane.f32.xlu0 %v1229_v42  ;;  %v1351_v42 = vsel %vm1165_vm1, %v1303_v22, 0.0  ;;  %v4281_v22 = vmax.f32 %v4119_v3, 0.0 }
 0x22a   : > { %v1256_v32 = vsel %vm1165_vm1, %v4281_v22, 0.0 }
 0x22b   : > { %1185 = vadd.xlane.f32.xlu1 %v1184_v47  ;;  %v1202_v47 = vsel %vm1165_vm1, %v4211_v53, 0.0 }
 0x22c   : > { %1194 = vadd.xlane.f32.xlu0 %v1193_v38  ;;  %v1308_v38 = vmul.f32 %v4203_v48, %v4203_v48 }
 0x22e   : > { %v1366_v11 = vsel %vm1165_vm1, %v1308_v38, 0.0 }
 0x22f   : > { %1382 = vadd.xlane.f32.xlu1 %v1381_v41  ;;  %v1318_v41 = vmul.f32 %v4216_v12, %v4216_v12 }
 0x230   : > { %1355 = vadd.xlane.f32.xlu0 %v1354_v50 }
 0x231   : > { %v1396_v50 = vsel %vm1165_vm1, %v1318_v41, 0.0 }
 0x233   : > { %1349 = vadd.xlane.f32.xlu1 %v1348_v10  ;;  %v1317_v10 = vmul.f32 %v4224_v14, %v4224_v14 }
 0x234   : > { %1200 = vadd.xlane.f32.xlu0 %v1199_v54  ;;  %v1247_v54 = vsel %vm1165_vm1, %v4236_v45, 0.0 }
 0x237   : > { %1346 = vadd.xlane.f32.xlu1 %v1345_v58  ;;  %v1393_v58 = vsel %vm1165_vm1, %v1317_v10, 0.0 }
 0x238   : > { %1197 = vadd.xlane.f32.xlu0 %v1196_v59  ;;  %v1244_v59 = vsel %vm1165_vm1, %v4243_v57, 0.0 }
 0x23b   : > { %1227 = vadd.xlane.f32.xlu1 %v1226_v1  ;;  %v1320_v1 = vmul.f32 %v4248_v30, %v4248_v30 }
 0x23c   : > { %1361 = vadd.xlane.f32.xlu0 %v1360_v61  ;;  %v4260_v61 = vmax.f32 %v4101_v51, 0.0 }
 0x23d   : > { %v1402_v4 = vsel %vm1165_vm1, %v1320_v1, 0.0 }
 0x23e   : > { %v1324_v51 = vmul.f32 %v4260_v61, %v4260_v61 }
 0x23f   : > { %1191 = vadd.xlane.f32.xlu1 %v1190_v6  ;;  %v1307_v6 = vmul.f32 %v4211_v53, %v4211_v53 }
 0x240   : > { %1358 = vadd.xlane.f32.xlu0 %v1357_v62  ;;  %v1253_v62 = vsel %vm1165_vm1, %v4260_v61, 0.0 }
 0x243   : > { %1391 = vadd.xlane.f32.xlu1 %v1390_v13  ;;  %v1363_v13 = vsel %vm1165_vm1, %v1307_v6, 0.0 }
 0x244   : > { %1239 = vadd.xlane.f32.xlu0 %v1238_v20  ;;  %v1414_v20 = vsel %vm1165_vm1, %v1324_v51, 0.0 }
 0x247   : > { %1388 = vadd.xlane.f32.xlu1 %v1387_v27  ;;  %v1405_v27 = vsel %vm1165_vm1, %v1321_v18, 0.0 }
 0x248   : > { %1206 = vadd.xlane.f32.xlu0 %v1205_v29  ;;  %v1411_v29 = vsel %vm1165_vm1, %v1323_v55, 0.0 }
 0x24b   : > { %1352 = vadd.xlane.f32.xlu1 %v1351_v42  ;;  %v4285_v42 = vmax.f32 %v4115_v60, 0.0 }
 0x24c   : > { %1203 = vadd.xlane.f32.xlu0 %v1202_v47  ;;  %v1250_v47 = vsel %vm1165_vm1, %v4267_v7, 0.0 }
 0x24d   : > { %v1259_v3 = vsel %vm1165_vm1, %v4285_v42, 0.0 }
 0x24f   : > { %1236 = vadd.xlane.f32.xlu1 %v1235_v37  ;;  %v1325_v37 = vmul.f32 %v4281_v22, %v4281_v22 }
 0x250   : > { %1400 = vadd.xlane.f32.xlu0 %v1399_v5  ;;  %v1326_v5 = vmul.f32 %v4285_v42, %v4285_v42 }
 0x251   : > { %v1417_v60 = vsel %vm1165_vm1, %v1325_v37, 0.0 }
 0x252   : > { %v1420_v38 = vsel %vm1165_vm1, %v1326_v5, 0.0 }
 0x253   : > { %1233 = vadd.xlane.f32.xlu1 %v1232_v9 }
 0x254   : > { %1367 = vadd.xlane.f32.xlu0 %v1366_v11 }
 0x257   : > { %1397 = vadd.xlane.f32.xlu1 %v1396_v50 }
 0x258   : > { %1248 = vadd.xlane.f32.xlu0 %v1247_v54 }
 0x25b   : > { %1394 = vadd.xlane.f32.xlu1 %v1393_v58 }
 0x25c   : > { %1245 = vadd.xlane.f32.xlu0 %v1244_v59 }
 0x25f   : > { %1242 = vadd.xlane.f32.xlu1 %v1241_v39 }
 0x260   : > { %1409 = vadd.xlane.f32.xlu0 %v1408_v21 }
 0x263   : > { %1403 = vadd.xlane.f32.xlu1 %v1402_v4 }
 0x264   : > { %1254 = vadd.xlane.f32.xlu0 %v1253_v62 }
 0x267   : > { %1364 = vadd.xlane.f32.xlu1 %v1363_v13 }
 0x268   : > { %1415 = vadd.xlane.f32.xlu0 %v1414_v20 }
 0x26b   : > { %1406 = vadd.xlane.f32.xlu1 %v1405_v27 }
 0x26c   : > { %1412 = vadd.xlane.f32.xlu0 %v1411_v29 }
 0x26f   : > { %1251 = vadd.xlane.f32.xlu1 %v1250_v47 }
 0x270   : > { %1257 = vadd.xlane.f32.xlu0 %v1256_v32 }
 0x273   : > { %1260 = vadd.xlane.f32.xlu1 %v1259_v3 }
 0x274   : > { %1418 = vadd.xlane.f32.xlu0 %v1417_v60 }
 0x277   : > { %1421 = vadd.xlane.f32.xlu1 %v1420_v38 }
 0x285   : > { %v1171_v9 = vpop.xlane.xlu0 %1170 }
 0x286   : > { %v1264_v50 = vmul.f32 0.015625, %v1171_v9 }
 0x288   : > { %v1329_v41 = vpop.xlane.xlu1 %1328  ;;  %v1456_v39 = vmul.f32 %v1264_v50, %v1264_v50 }
 0x289   : > { %v1168_v11 = vpop.xlane.xlu0 %1167  ;;  %v1423_v54 = vmul.f32 0.015625, %v1329_v41 }
 0x28a   : > { %v1263_v10 = vmul.f32 0.015625, %v1168_v11 }
 0x28c   : > { %v1455_v58 = vmul.f32 %v1263_v10, %v1263_v10  ;;  %v1177_v59 = vpop.xlane.xlu1 %1176 }
 0x28d   : > { %v1332_v63 = vpop.xlane.xlu0 %1331  ;;  %v4301_v29 = vmul.f32 0.015625, %v1177_v59 }
 0x28e   : > { %v1487_v1 = vsub.f32 %v1423_v54, %v1455_v58  ;;  %v1424_v21 = vmul.f32 0.015625, %v1332_v63 }
 0x28f   : > { %v1458_v38 = vmul.f32 %v4301_v29, %v4301_v29 }
 0x290   : > { %v1519_v4 = vmax.f32 %v1487_v1, 0.0  ;;  %v1488_v6 = vsub.f32 %v1424_v21, %v1456_v39  ;;  %v1210_v62 = vpop.xlane.xlu1 %1209  ;;  %v1551_v21 = vsub.f32 %v3984_v16, %v1263_v10 }
 0x291   : > { %v1213_v51 = vpop.xlane.xlu0 %1212  ;;  %v4303_v32 = vmul.f32 0.015625, %v1210_v62 }
 0x292   : > { %v1583_v13 = vadd.f32 1e-05, %v1519_v4  ;;  %v1520_v18 = vmax.f32 %v1488_v6, 0.0  ;;  %v4299_v20 = vmul.f32 0.015625, %v1213_v51 }
 0x293   : > { %v1469_v11 = vmul.f32 %v4303_v32, %v4303_v32 }
 0x294   : > { %3449 = vrsqrt.f32 %v1583_v13  ;;  %v1584_v55 = vadd.f32 1e-05, %v1520_v18  ;;  %v1174_v27 = vpop.xlane.xlu1 %1173  ;;  %v1470_v37 = vmul.f32 %v4299_v20, %v4299_v20  ;;  %v4317_v18 = vld [vmem:[%s5163_s6] ss:$0 sm:$0xff] }
 0x295   : > { %v1374_v47 = vpop.xlane.xlu0 %1373  ;;  %v4312_v51 = vmul.f32 0.015625, %v1174_v27 }
 0x296   : > { %3451 = vrsqrt.f32 %v1584_v55  ;;  %v1438_v3 = vmul.f32 0.015625, %v1374_v47  ;;  %v1552_v55 = vsub.f32 %v3982_v15, %v1264_v50 }
 0x298   : > { %v1502_v5 = vsub.f32 %v1438_v3, %v1470_v37  ;;  %v1338_v60 = vpop.xlane.xlu1 %1337 }
 0x299   : > { %v1426_v9 = vmul.f32 0.015625, %v1338_v60  ;;  %v1371_v41 = vpop.xlane.xlu0 %1370 }
 0x29a   : > { %v1534_v54 = vmax.f32 %v1502_v5, 0.0  ;;  %v1437_v58 = vmul.f32 0.015625, %v1371_v41 }
 0x29b   : > { %v1490_v59 = vsub.f32 %v1426_v9, %v1458_v38  ;;  %v1457_v38 = vmul.f32 %v4312_v51, %v4312_v51 }
 0x29c   : > { %v1598_v63 = vadd.f32 1e-05, %v1534_v54  ;;  %v1501_v39 = vsub.f32 %v1437_v58, %v1469_v11  ;;  %v1216_v1 = vpop.xlane.xlu1 %1215 }
 0x29d   : > { %v1522_v4 = vmax.f32 %v1490_v59, 0.0  ;;  %v1219_v6 = vpop.xlane.xlu0 %1218  ;;  %v4327_v58 = vmul.f32 0.015625, %v1216_v1  ;;  %v1554_v1 = vsub.f32 %v3991_v23, %v4301_v29 }
 0x29e   : > { %v3450_v62 = vpop.eup %3449  ;;  %3453 = vrsqrt.f32 %v1598_v63  ;;  %v1533_v13 = vmax.f32 %v1501_v39, 0.0  ;;  %v4323_v9 = vmul.f32 0.015625, %v1219_v6 }
 0x29f   : > { %v1586_v47 = vadd.f32 1e-05, %v1522_v4  ;;  %v1647_v37 = vmul.f32 %v3450_v62, %v1551_v21  ;;  %v1566_v62 = vsub.f32 %v4005_v40, %v4299_v20  ;;  %v1565_v20 = vsub.f32 %v4000_v35, %v4303_v32 }
 0x2a0   : > { %v3452_v3 = vpop.eup %3451  ;;  %v1597_v5 = vadd.f32 1e-05, %v1533_v13  ;;  %v1183_v60 = vpop.xlane.xlu1 %1182  ;;  %v1472_v39 = vmul.f32 %v4323_v9, %v4323_v9 }
 0x2a1   : > { %3455 = vrsqrt.f32 %v1586_v47  ;;  %v1335_v16 = vpop.xlane.xlu0 %1334  ;;  %v1686_v10 = vmul.f32 %v4317_v18, %v1647_v37  ;;  %v1648_v27 = vmul.f32 %v3452_v3, %v1552_v55  ;;  %v4332_v21 = vmul.f32 0.015625, %v1183_v60 }
 0x2a2   : > { %3457 = vrsqrt.f32 %v1597_v5  ;;  %v1425_v41 = vmul.f32 0.015625, %v1335_v16  ;;  %v1471_v3 = vmul.f32 %v4327_v58, %v4327_v58 }
 0x2a3   : > { %v1718_v11 = vsel %vm1165_vm1, %v1686_v10, 0.0  ;;  %v1687_v15 = vmul.f32 %v4317_v18, %v1648_v27  ;;  %v1460_v10 = vmul.f32 %v4332_v21, %v4332_v21 }
 0x2a4   : > { %v1489_v50 = vsub.f32 %v1425_v41, %v1457_v38  ;;  %v1180_v54 = vpop.xlane.xlu1 %1179  ;;  %1719 = vadd.xlane.f32.xlu0 %v1718_v11 }
 0x2a5   : > { %v1380_v59 = vpop.xlane.xlu0 %1379  ;;  %v1721_v63 = vsel %vm1165_vm1, %v1687_v15, 0.0 }
 0x2a6   : > { %v1521_v4 = vmax.f32 %v1489_v50, 0.0  ;;  %v1440_v6 = vmul.f32 0.015625, %v1380_v59  ;;  %1722 = vadd.xlane.f32.xlu1 %v1721_v63  ;;  %v4345_v63 = vmul.f32 0.015625, %v1180_v54 }
 0x2a8   : > { %v3454_v13 = vpop.eup %3453  ;;  %v1585_v55 = vadd.f32 1e-05, %v1521_v4  ;;  %v1504_v47 = vsub.f32 %v1440_v6, %v1472_v39  ;;  %v1377_v37 = vpop.xlane.xlu1 %1376 }
 0x2a9   : > { %v1439_v5 = vmul.f32 0.015625, %v1377_v37  ;;  %v1344_v16 = vpop.xlane.xlu0 %1343  ;;  %v1662_v60 = vmul.f32 %v3454_v13, %v1566_v62 }
 0x2aa   : > { %3459 = vrsqrt.f32 %v1585_v55  ;;  %v1536_v27 = vmax.f32 %v1504_v47, 0.0  ;;  %v1428_v38 = vmul.f32 0.015625, %v1344_v16 }
 0x2ab   : > { %v3456_v40 = vpop.eup %3455  ;;  %v1503_v41 = vsub.f32 %v1439_v5, %v1471_v3  ;;  %v1701_v11 = vmul.f32 %v4317_v18, %v1662_v60 }
 0x2ac   : > { %v3458_v23 = vpop.eup %3457  ;;  %v1600_v29 = vadd.f32 1e-05, %v1536_v27  ;;  %v1492_v15 = vsub.f32 %v1428_v38, %v1460_v10  ;;  %v1225_v50 = vpop.xlane.xlu1 %1224  ;;  %v1650_v59 = vmul.f32 %v3456_v40, %v1554_v1  ;;  %v1459_v1 = vmul.f32 %v4345_v63, %v4345_v63 }
 0x2ad   : > { %v1535_v39 = vmax.f32 %v1503_v41, 0.0  ;;  %v1189_v4 = vpop.xlane.xlu0 %1188  ;;  %v1763_v6 = vsel %vm1165_vm1, %v1701_v11, 0.0  ;;  %v1661_v62 = vmul.f32 %v3458_v23, %v1565_v20  ;;  %v4348_v55 = vmul.f32 0.015625, %v1225_v50 }
 0x2ae   : > { %3461 = vrsqrt.f32 %v1600_v29  ;;  %v1524_v13 = vmax.f32 %v1492_v15, 0.0  ;;  %1764 = vadd.xlane.f32.xlu0 %v1763_v6  ;;  %v1689_v35 = vmul.f32 %v4317_v18, %v1650_v59  ;;  %v1553_v27 = vsub.f32 %v4012_v43, %v4312_v51 }
 0x2af   : > { %v1599_v32 = vadd.f32 1e-05, %v1535_v39  ;;  %v1700_v54 = vmul.f32 %v4317_v18, %v1661_v62  ;;  %v1474_v60 = vmul.f32 %v4348_v55, %v4348_v55  ;;  %v1568_v59 = vsub.f32 %v4050_v36, %v4323_v9 }
 0x2b0   : > { %v1588_v47 = vadd.f32 1e-05, %v1524_v13  ;;  %v1341_v37 = vpop.xlane.xlu1 %1340  ;;  %v1727_v3 = vsel %vm1165_vm1, %v1689_v35, 0.0  ;;  %v1556_v36 = vsub.f32 %v4065_v17, %v4332_v21 }
 0x2b1   : > { %3463 = vrsqrt.f32 %v1599_v32  ;;  %v1427_v5 = vmul.f32 0.015625, %v1341_v37  ;;  %v1386_v16 = vpop.xlane.xlu0 %1385  ;;  %1728 = vadd.xlane.f32.xlu1 %v1727_v3  ;;  %v1760_v11 = vsel %vm1165_vm1, %v1700_v54, 0.0  ;;  %v1567_v37 = vsub.f32 %v4047_v2, %v4327_v58 }
 0x2b2   : > { %3465 = vrsqrt.f32 %v1588_v47  ;;  %v1442_v10 = vmul.f32 0.015625, %v1386_v16 }
 0x2b3   : > { %v1491_v38 = vsub.f32 %v1427_v5, %v1459_v1  ;;  %v4373_v1 = vmul.f32 0.015625, %v1189_v4 }
 0x2b4   : > { %v3460_v40 = vpop.eup %3459  ;;  %v1506_v20 = vsub.f32 %v1442_v10, %v1474_v60  ;;  %v1222_v41 = vpop.xlane.xlu1 %1221 }
 0x2b5   : > { %v1523_v23 = vmax.f32 %v1491_v38, 0.0  ;;  %v4360_v29 = vpop.xlane.xlu0 %1230  ;;  %1761 = vadd.xlane.f32.xlu1 %v1760_v11  ;;  %v1649_v15 = vmul.f32 %v3460_v40, %v1553_v27  ;;  %v4365_v13 = vmul.f32 0.015625, %v1222_v41  ;;  %v1462_v41 = vmul.f32 %v4373_v1, %v4373_v1 }
 0x2b6   : > { %v1538_v50 = vmax.f32 %v1506_v20, 0.0 }
 0x2b7   : > { %v1587_v39 = vadd.f32 1e-05, %v1523_v23  ;;  %v1688_v6 = vmul.f32 %v4317_v18, %v1649_v15  ;;  %v1473_v60 = vmul.f32 %v4365_v13, %v4365_v13 }
 0x2b8   : > { %v3462_v62 = vpop.eup %3461  ;;  %v1602_v43 = vadd.f32 1e-05, %v1538_v50  ;;  %v1186_v51 = vpop.xlane.xlu1 %1185 }
 0x2b9   : > { %3467 = vrsqrt.f32 %v1587_v39  ;;  %v1195_v35 = vpop.xlane.xlu0 %1194  ;;  %v1724_v32 = vsel %vm1165_vm1, %v1688_v6, 0.0  ;;  %v1664_v47 = vmul.f32 %v3462_v62, %v1568_v59  ;;  %v4380_v21 = vmul.f32 0.015625, %v1186_v51 }
 0x2ba   : > { %3469 = vrsqrt.f32 %v1602_v43  ;;  %1725 = vadd.xlane.f32.xlu0 %v1724_v32  ;;  %v1555_v59 = vsub.f32 %v4080_v28, %v4345_v63  ;;  %v1570_v6 = vsub.f32 %v4109_v56, %v4348_v55 }
 0x2bb   : > { %v3464_v3 = vpop.eup %3463  ;;  %v1703_v9 = vmul.f32 %v4317_v18, %v1664_v47  ;;  %v1461_v32 = vmul.f32 %v4380_v21, %v4380_v21  ;;  %v4392_v47 = vmul.f32 0.015625, %v1195_v35 }
 0x2bc   : > { %v3466_v54 = vpop.eup %3465  ;;  %v1383_v5 = vpop.xlane.xlu1 %1382  ;;  %v1663_v16 = vmul.f32 %v3464_v3, %v1567_v37 }
 0x2bd   : > { %v1441_v10 = vmul.f32 0.015625, %v1383_v5  ;;  %v1356_v27 = vpop.xlane.xlu0 %1355  ;;  %v1769_v2 = vsel %vm1165_vm1, %v1703_v9, 0.0  ;;  %v1652_v58 = vmul.f32 %v3466_v54, %v1556_v36 }
 0x2be   : > { %1770 = vadd.xlane.f32.xlu0 %v1769_v2  ;;  %v1702_v38 = vmul.f32 %v4317_v18, %v1663_v16  ;;  %v1432_v63 = vmul.f32 0.015625, %v1356_v27 }
 0x2bf   : > { %v1505_v40 = vsub.f32 %v1441_v10, %v1473_v60  ;;  %v1691_v17 = vmul.f32 %v4317_v18, %v1652_v58  ;;  %v1464_v60 = vmul.f32 %v4392_v47, %v4392_v47 }
 0x2c0   : > { %v1350_v4 = vpop.xlane.xlu1 %1349  ;;  %v1766_v20 = vsel %vm1165_vm1, %v1702_v38, 0.0 }
 0x2c1   : > { %v1537_v11 = vmax.f32 %v1505_v40, 0.0  ;;  %v1430_v23 = vmul.f32 0.015625, %v1350_v4  ;;  %v1201_v15 = vpop.xlane.xlu0 %1200  ;;  %1767 = vadd.xlane.f32.xlu1 %v1766_v20  ;;  %v1733_v50 = vsel %vm1165_vm1, %v1691_v17, 0.0  ;;  %v1496_v40 = vsub.f32 %v1432_v63, %v1464_v60 }
 0x2c2   : > { %1734 = vadd.xlane.f32.xlu0 %v1733_v50  ;;  %v4400_v17 = vmul.f32 0.015625, %v1201_v15  ;;  %v4403_v20 = vmul.f32 0.015625, %v4360_v29 }
 0x2c3   : > { %v3468_v39 = vpop.eup %3467  ;;  %v1601_v62 = vadd.f32 1e-05, %v1537_v11  ;;  %v1494_v43 = vsub.f32 %v1430_v23, %v1462_v41  ;;  %v1569_v11 = vsub.f32 %v4135_v19, %v4365_v13  ;;  %v1528_v23 = vmax.f32 %v1496_v40, 0.0 }
 0x2c4   : > { %v3470_v51 = vpop.eup %3469  ;;  %v1347_v37 = vpop.xlane.xlu1 %1346  ;;  %v1651_v3 = vmul.f32 %v3468_v39, %v1555_v59  ;;  %v1466_v39 = vmul.f32 %v4400_v17, %v4400_v17 }
 0x2c5   : > { %3471 = vrsqrt.f32 %v1601_v62  ;;  %v1526_v36 = vmax.f32 %v1494_v43, 0.0  ;;  %v1429_v9 = vmul.f32 0.015625, %v1347_v37  ;;  %v1198_v54 = vpop.xlane.xlu0 %1197  ;;  %v1666_v28 = vmul.f32 %v3470_v51, %v1570_v6 }
 0x2c6   : > { %v1690_v5 = vmul.f32 %v4317_v18, %v1651_v3  ;;  %v4409_v6 = vmul.f32 0.015625, %v1198_v54  ;;  %v1476_v43 = vmul.f32 %v4403_v20, %v4403_v20  ;;  %v1592_v37 = vadd.f32 1e-05, %v1528_v23 }
 0x2c7   : > { %v1590_v16 = vadd.f32 1e-05, %v1526_v36  ;;  %v1493_v56 = vsub.f32 %v1429_v9, %v1461_v32  ;;  %v1705_v55 = vmul.f32 %v4317_v18, %v1666_v28  ;;  %v1558_v36 = vsub.f32 %v4112_v34, %v4373_v1 }
 0x2c8   : > { %v1228_v10 = vpop.xlane.xlu1 %1227  ;;  %v1730_v35 = vsel %vm1165_vm1, %v1690_v5, 0.0  ;;  %v1465_v28 = vmul.f32 %v4409_v6, %v4409_v6  ;;  %v1557_v34 = vsub.f32 %v4143_v26, %v4380_v21 }
 0x2c9   : > { %3473 = vrsqrt.f32 %v1590_v16  ;;  %v1525_v2 = vmax.f32 %v1493_v56, 0.0  ;;  %v1362_v58 = vpop.xlane.xlu0 %1361  ;;  %1731 = vadd.xlane.f32.xlu1 %v1730_v35  ;;  %v1775_v38 = vsel %vm1165_vm1, %v1705_v55, 0.0  ;;  %v4413_v29 = vmul.f32 0.015625, %v1228_v10 }
 0x2ca   : > { %1776 = vadd.xlane.f32.xlu0 %v1775_v38  ;;  %v1434_v50 = vmul.f32 0.015625, %v1362_v58 }
 0x2cb   : > { %v1589_v27 = vadd.f32 1e-05, %v1525_v2  ;;  %v1475_v56 = vmul.f32 %v4413_v29, %v4413_v29 }
 0x2cc   : > { %v1192_v4 = vpop.xlane.xlu1 %1191  ;;  %v1498_v3 = vsub.f32 %v1434_v50, %v1466_v39 }
 0x2cd   : > { %3475 = vrsqrt.f32 %v1589_v27  ;;  %v1359_v41 = vpop.xlane.xlu0 %1358  ;;  %v4420_v63 = vmul.f32 0.015625, %v1192_v4 }
 0x2ce   : > { %v1433_v9 = vmul.f32 0.015625, %v1359_v41  ;;  %3477 = vrsqrt.f32 %v1592_v37  ;;  %v1530_v1 = vmax.f32 %v1498_v3, 0.0 }
 0x2cf   : > { %v3472_v59 = vpop.eup %3471  ;;  %v1463_v4 = vmul.f32 %v4420_v63, %v4420_v63 }
 0x2d0   : > { %v1392_v62 = vpop.xlane.xlu1 %1391  ;;  %v1665_v15 = vmul.f32 %v3472_v59, %v1569_v11  ;;  %v1497_v58 = vsub.f32 %v1433_v9, %v1465_v28 }
 0x2d1   : > { %v1444_v51 = vmul.f32 0.015625, %v1392_v62  ;;  %v1240_v32 = vpop.xlane.xlu0 %1239  ;;  %v1594_v62 = vadd.f32 1e-05, %v1530_v1 }
 0x2d2   : > { %v1704_v19 = vmul.f32 %v4317_v18, %v1665_v15  ;;  %v4433_v21 = vmul.f32 0.015625, %v1240_v32  ;;  %v1529_v15 = vmax.f32 %v1497_v58, 0.0 }
 0x2d3   : > { %v3474_v13 = vpop.eup %3473  ;;  %v1508_v54 = vsub.f32 %v1444_v51, %v1476_v43 }
 0x2d4   : > { %v1389_v5 = vpop.xlane.xlu1 %1388  ;;  %v1772_v16 = vsel %vm1165_vm1, %v1704_v19, 0.0  ;;  %v1654_v35 = vmul.f32 %v3474_v13, %v1558_v36  ;;  %v1479_v36 = vmul.f32 %v4433_v21, %v4433_v21  ;;  %v1593_v32 = vadd.f32 1e-05, %v1529_v15 }
 0x2d5   : > { %v1540_v55 = vmax.f32 %v1508_v54, 0.0  ;;  %v1443_v60 = vmul.f32 0.015625, %v1389_v5  ;;  %v1207_v10 = vpop.xlane.xlu0 %1206  ;;  %1773 = vadd.xlane.f32.xlu1 %v1772_v16 }
 0x2d6   : > { %v1693_v27 = vmul.f32 %v4317_v18, %v1654_v35  ;;  %v1560_v35 = vsub.f32 %v4147_v25, %v4392_v47  ;;  %v1571_v25 = vsub.f32 %v4176_v44, %v4413_v29  ;;  %v1562_v29 = vsub.f32 %v4164_v49, %v4400_v17 }
 0x2d7   : > { %v3476_v2 = vpop.eup %3475  ;;  %v1604_v38 = vadd.f32 1e-05, %v1540_v55  ;;  %v1507_v40 = vsub.f32 %v1443_v60, %v1475_v56  ;;  %v1572_v60 = vsub.f32 %v4140_v24, %v4403_v20 }
 0x2d8   : > { %v1353_v41 = vpop.xlane.xlu1 %1352  ;;  %v1653_v11 = vmul.f32 %v3476_v2, %v1557_v34  ;;  %v1739_v26 = vsel %vm1165_vm1, %v1693_v27, 0.0  ;;  %v3478_v28 = vpop.eup %3477  ;;  %v4445_v2 = vmul.f32 0.015625, %v1207_v10 }
 0x2d9   : > { %3479 = vrsqrt.f32 %v1604_v38  ;;  %v1539_v23 = vmax.f32 %v1507_v40, 0.0  ;;  %v1431_v50 = vmul.f32 0.015625, %v1353_v41  ;;  %v4430_v59 = vpop.xlane.xlu0 %1203  ;;  %1740 = vadd.xlane.f32.xlu0 %v1739_v26  ;;  %v1656_v27 = vmul.f32 %v3478_v28, %v1560_v35 }
 0x2da   : > { %v1692_v39 = vmul.f32 %v4317_v18, %v1653_v11 }
 0x2db   : > { %v1603_v43 = vadd.f32 1e-05, %v1539_v23  ;;  %v1495_v51 = vsub.f32 %v1431_v50, %v1463_v4  ;;  %v1468_v50 = vmul.f32 %v4445_v2, %v4445_v2 }
 0x2dc   : > { %v1237_v37 = vpop.xlane.xlu1 %1236  ;;  %v1736_v3 = vsel %vm1165_vm1, %v1692_v39, 0.0 }
 0x2dd   : > { %3481 = vrsqrt.f32 %v1603_v43  ;;  %v1527_v19 = vmax.f32 %v1495_v51, 0.0  ;;  %v1401_v13 = vpop.xlane.xlu0 %1400  ;;  %1737 = vadd.xlane.f32.xlu0 %v1736_v3  ;;  %v4439_v56 = vmul.f32 0.015625, %v1237_v37 }
 0x2de   : > { %v1447_v9 = vmul.f32 0.015625, %v1401_v13  ;;  %3483 = vrsqrt.f32 %v1594_v62  ;;  %v1695_v62 = vmul.f32 %v4317_v18, %v1656_v27 }
 0x2df   : > { %v1591_v54 = vadd.f32 1e-05, %v1527_v19  ;;  %v1478_v4 = vmul.f32 %v4439_v56, %v4439_v56  ;;  %v1559_v19 = vsub.f32 %v4184_v0, %v4420_v63  ;;  %v1561_v0 = vsub.f32 %v4171_v52, %v4409_v6 }
 0x2e0   : > { %v1511_v5 = vsub.f32 %v1447_v9, %v1479_v36  ;;  %v1234_v16 = vpop.xlane.xlu1 %1233  ;;  %v1745_v28 = vsel %vm1165_vm1, %v1695_v62, 0.0 }
 0x2e1   : > { %3485 = vrsqrt.f32 %v1591_v54  ;;  %v1368_v55 = vpop.xlane.xlu0 %1367  ;;  %v4449_v41 = vmul.f32 0.015625, %v1234_v16 }
 0x2e2   : > { %v1543_v34 = vmax.f32 %v1511_v5, 0.0  ;;  %3487 = vrsqrt.f32 %v1593_v32  ;;  %v1436_v47 = vmul.f32 0.015625, %v1368_v55 }
 0x2e3   : > { %v3480_v1 = vpop.eup %3479  ;;  %v1477_v43 = vmul.f32 %v4449_v41, %v4449_v41 }
 0x2e4   : > { %v1607_v58 = vadd.f32 1e-05, %v1543_v34  ;;  %v1398_v38 = vpop.xlane.xlu1 %1397  ;;  %v1668_v40 = vmul.f32 %v3480_v1, %v1572_v60  ;;  %v1500_v36 = vsub.f32 %v1436_v47, %v1468_v50  ;;  %v4474_v1 = vmul.f32 0.015625, %v4430_v59 }
 0x2e5   : > { %v1446_v11 = vmul.f32 0.015625, %v1398_v38  ;;  %v1249_v23 = vpop.xlane.xlu0 %1248  ;;  %v1575_v47 = vsub.f32 %v4196_v8, %v4433_v21  ;;  %v1574_v8 = vsub.f32 %v4216_v12, %v4439_v56 }
 0x2e6   : > { %v1707_v24 = vmul.f32 %v4317_v18, %v1668_v40  ;;  %3489 = vrsqrt.f32 %v1607_v58  ;;  %v4466_v35 = vmul.f32 0.015625, %v1249_v23  ;;  %v1532_v58 = vmax.f32 %v1500_v36, 0.0 }
 0x2e7   : > { %v3482_v20 = vpop.eup %3481  ;;  %v1510_v10 = vsub.f32 %v1446_v11, %v1478_v4 }
 0x2e8   : > { %v1395_v26 = vpop.xlane.xlu1 %1394  ;;  %v1781_v39 = vsel %vm1165_vm1, %v1707_v24, 0.0  ;;  %v3484_v15 = vpop.eup %3483  ;;  %v1667_v44 = vmul.f32 %v3482_v20, %v1571_v25  ;;  %v1482_v52 = vmul.f32 %v4466_v35, %v4466_v35  ;;  %v1596_v50 = vadd.f32 1e-05, %v1532_v58 }
 0x2e9   : > { %v1542_v51 = vmax.f32 %v1510_v10, 0.0  ;;  %v1445_v37 = vmul.f32 0.015625, %v1395_v26  ;;  %v1246_v3 = vpop.xlane.xlu0 %1245  ;;  %1782 = vadd.xlane.f32.xlu0 %v1781_v39  ;;  %v1658_v55 = vmul.f32 %v3484_v15, %v1562_v29 }
 0x2ea   : > { %v1706_v5 = vmul.f32 %v4317_v18, %v1667_v44  ;;  %v4491_v44 = vmul.f32 0.015625, %v1246_v3 }
 0x2eb   : > { %v3486_v13 = vpop.eup %3485  ;;  %v1606_v9 = vadd.f32 1e-05, %v1542_v51  ;;  %v1509_v32 = vsub.f32 %v1445_v37, %v1477_v43  ;;  %v1697_v23 = vmul.f32 %v4317_v18, %v1658_v55  ;;  %v1467_v37 = vmul.f32 %v4474_v1, %v4474_v1 }
 0x2ec   : > { %v1243_v54 = vpop.xlane.xlu1 %1242  ;;  %v1655_v16 = vmul.f32 %v3486_v13, %v1559_v19  ;;  %v3488_v60 = vpop.eup %3487  ;;  %v1778_v4 = vsel %vm1165_vm1, %v1706_v5, 0.0 }
 0x2ed   : > { %3491 = vrsqrt.f32 %v1606_v9  ;;  %v1541_v34 = vmax.f32 %v1509_v32, 0.0  ;;  %v4468_v49 = vmul.f32 0.015625, %v1243_v54  ;;  %v1410_v17 = vpop.xlane.xlu0 %1409  ;;  %1746 = vadd.xlane.f32.xlu0 %v1745_v28  ;;  %v1657_v24 = vmul.f32 %v3488_v60, %v1561_v0 }
 0x2ee   : > { %v1694_v63 = vmul.f32 %v4317_v18, %v1655_v16  ;;  %v1450_v40 = vmul.f32 0.015625, %v1410_v17  ;;  %v1751_v15 = vsel %vm1165_vm1, %v1697_v23, 0.0  ;;  %v1573_v0 = vsub.f32 %v4224_v14, %v4449_v41 }
 0x2ef   : > { %v1605_v38 = vadd.f32 1e-05, %v1541_v34  ;;  %v1480_v6 = vmul.f32 %v4468_v49, %v4468_v49  ;;  %v1696_v43 = vmul.f32 %v4317_v18, %v1657_v24  ;;  %v1481_v34 = vmul.f32 %v4491_v44, %v4491_v44 }
 0x2f0   : > { %v1404_v27 = vpop.xlane.xlu1 %1403  ;;  %v1742_v11 = vsel %vm1165_vm1, %v1694_v63, 0.0  ;;  %v3490_v20 = vpop.eup %3489  ;;  %v1514_v26 = vsub.f32 %v1450_v40, %v1482_v52 }
 0x2f1   : > { %3493 = vrsqrt.f32 %v1605_v38  ;;  %v1448_v59 = vmul.f32 0.015625, %v1404_v27  ;;  %v1255_v25 = vpop.xlane.xlu0 %1254  ;;  %1779 = vadd.xlane.f32.xlu0 %v1778_v4  ;;  %1743 = vadd.xlane.f32.xlu1 %v1742_v11  ;;  %v1671_v51 = vmul.f32 %v3490_v20, %v1575_v47  ;;  %v1748_v3 = vsel %vm1165_vm1, %v1696_v43, 0.0 }
 0x2f2   : > { %v4485_v10 = vmul.f32 0.015625, %v1255_v25  ;;  %3495 = vrsqrt.f32 %v1596_v50  ;;  %v1546_v32 = vmax.f32 %v1514_v26, 0.0 }
 0x2f3   : > { %v1512_v39 = vsub.f32 %v1448_v59, %v1480_v6  ;;  %v1710_v55 = vmul.f32 %v4317_v18, %v1671_v51 }
 0x2f4   : > { %v1365_v62 = vpop.xlane.xlu1 %1364  ;;  %v1484_v21 = vmul.f32 %v4485_v10, %v4485_v10  ;;  %v1610_v40 = vadd.f32 1e-05, %v1546_v32 }
 0x2f5   : > { %v1544_v29 = vmax.f32 %v1512_v39, 0.0  ;;  %v1435_v19 = vmul.f32 0.015625, %v1365_v62  ;;  %v1416_v13 = vpop.xlane.xlu0 %1415  ;;  %1752 = vadd.xlane.f32.xlu0 %v1751_v15  ;;  %v1790_v24 = vsel %vm1165_vm1, %v1710_v55, 0.0  ;;  %v1580_v55 = vsub.f32 %v4260_v61, %v4485_v10 }
 0x2f6   : > { %v1452_v36 = vmul.f32 0.015625, %v1416_v13 }
 0x2f7   : > { %v3492_v9 = vpop.eup %3491  ;;  %v1608_v54 = vadd.f32 1e-05, %v1544_v29  ;;  %v1499_v28 = vsub.f32 %v1435_v19, %v1467_v37  ;;  %v1564_v29 = vsub.f32 %v4203_v48, %v4445_v2  ;;  %v1576_v19 = vsub.f32 %v4248_v30, %v4468_v49 }
 0x2f8   : > { %v1516_v5 = vsub.f32 %v1452_v36, %v1484_v21  ;;  %v1407_v16 = vpop.xlane.xlu1 %1406  ;;  %v1670_v60 = vmul.f32 %v3492_v9, %v1574_v8  ;;  %v1563_v48 = vsub.f32 %v4211_v53, %v4474_v1  ;;  %v1578_v1 = vsub.f32 %v4236_v45, %v4466_v35 }
 0x2f9   : > { %3497 = vrsqrt.f32 %v1608_v54  ;;  %v1531_v12 = vmax.f32 %v1499_v28, 0.0  ;;  %v1449_v56 = vmul.f32 0.015625, %v1407_v16  ;;  %v1413_v17 = vpop.xlane.xlu0 %1412  ;;  %1749 = vadd.xlane.f32.xlu0 %v1748_v3 }
 0x2fa   : > { %v1548_v63 = vmax.f32 %v1516_v5, 0.0  ;;  %v1709_v58 = vmul.f32 %v4317_v18, %v1670_v60  ;;  %v1451_v50 = vmul.f32 0.015625, %v1413_v17 }
 0x2fb   : > { %v3494_v38 = vpop.eup %3493  ;;  %v1595_v27 = vadd.f32 1e-05, %v1531_v12  ;;  %v1513_v4 = vsub.f32 %v1449_v56, %v1481_v34 }
 0x2fc   : > { %v1612_v11 = vadd.f32 1e-05, %v1548_v63  ;;  %v1252_v23 = vpop.xlane.xlu1 %1251  ;;  %v1787_v20 = vsel %vm1165_vm1, %v1709_v58, 0.0  ;;  %v1669_v52 = vmul.f32 %v3494_v38, %v1573_v0  ;;  %v3496_v15 = vpop.eup %3495 }
 0x2fd   : > { %3499 = vrsqrt.f32 %v1595_v27  ;;  %v1545_v6 = vmax.f32 %v1513_v4, 0.0  ;;  %v4506_v59 = vmul.f32 0.015625, %v1252_v23  ;;  %v1258_v25 = vpop.xlane.xlu0 %1257  ;;  %1791 = vadd.xlane.f32.xlu0 %v1790_v24  ;;  %1788 = vadd.xlane.f32.xlu1 %v1787_v20  ;;  %v1660_v28 = vmul.f32 %v3496_v15, %v1564_v29 }
 0x2fe   : > { %3501 = vrsqrt.f32 %v1612_v11  ;;  %v4508_v14 = vmul.f32 0.015625, %v1258_v25  ;;  %v1708_v41 = vmul.f32 %v4317_v18, %v1669_v52  ;;  %v1577_v23 = vsub.f32 %v4243_v57, %v4491_v44 }
 0x2ff   : > { %3503 = vrsqrt.f32 %v1610_v40  ;;  %v1609_v47 = vadd.f32 1e-05, %v1545_v6  ;;  %v1483_v26 = vmul.f32 %v4506_v59, %v4506_v59  ;;  %v1699_v17 = vmul.f32 %v4317_v18, %v1660_v28 }
 0x300   : > { %v1261_v39 = vpop.xlane.xlu1 %1260  ;;  %v1784_v62 = vsel %vm1165_vm1, %v1708_v41, 0.0  ;;  %v1485_v13 = vmul.f32 %v4508_v14, %v4508_v14  ;;  %v1579_v52 = vsub.f32 %v4267_v7, %v4506_v59  ;;  %v1581_v6 = vsub.f32 %v4281_v22, %v4508_v14 }
 0x301   : > { %v1515_v43 = vsub.f32 %v1451_v50, %v1483_v26  ;;  %v4514_v51 = vmul.f32 0.015625, %v1261_v39  ;;  %v1419_v37 = vpop.xlane.xlu0 %1418  ;;  %1785 = vadd.xlane.f32.xlu1 %v1784_v62  ;;  %3505 = vrsqrt.f32 %v1609_v47  ;;  %v1757_v10 = vsel %vm1165_vm1, %v1699_v17, 0.0 }
 0x302   : > { %v1453_v8 = vmul.f32 0.015625, %v1419_v37 }
 0x303   : > { %v3498_v21 = vpop.eup %3497  ;;  %v1547_v36 = vmax.f32 %v1515_v43, 0.0  ;;  %v1486_v16 = vmul.f32 %v4514_v51, %v4514_v51  ;;  %v1582_v50 = vsub.f32 %v4285_v42, %v4514_v51 }
 0x304   : > { %v1517_v9 = vsub.f32 %v1453_v8, %v1485_v13  ;;  %v1422_v32 = vpop.xlane.xlu1 %1421  ;;  %v1672_v54 = vmul.f32 %v3498_v21, %v1576_v19  ;;  %v1881_v21 = vand.u32 127, %v501_v31 }
 0x305   : > { %v1611_v5 = vadd.f32 1e-05, %v1547_v36  ;;  %v1454_v3 = vmul.f32 0.015625, %v1422_v32 }
 0x306   : > { %v1549_v30 = vmax.f32 %v1517_v9, 0.0  ;;  %v1711_v2 = vmul.f32 %v4317_v18, %v1672_v54  ;;  %v4561_v9 = vstv %s1814_s19  ;;  %v4570_v28 = vsub.s32 %v1881_v21, %v3861_v33 }
 0x307   : > { %v3500_v49 = vpop.eup %3499  ;;  %3507 = vrsqrt.f32 %v1611_v5  ;;  %v1518_v60 = vsub.f32 %v1454_v3, %v1486_v16 }
 0x308   : > { %v3502_v34 = vpop.eup %3501  ;;  %v1613_v12 = vadd.f32 1e-05, %v1549_v30  ;;  %v1793_v56 = vsel %vm1165_vm1, %v1711_v2, 0.0  ;;  %v1659_v0 = vmul.f32 %v3500_v49, %v1563_v48 }
 0x309   : > { %v3504_v63 = vpop.eup %3503  ;;  %v1550_v58 = vmax.f32 %v1518_v60, 0.0  ;;  %1794 = vadd.xlane.f32.xlu1 %v1793_v56  ;;  %v1676_v53 = vmul.f32 %v3502_v34, %v1580_v55 }
 0x30a   : > { %3509 = vrsqrt.f32 %v1613_v12  ;;  %v1698_v40 = vmul.f32 %v4317_v18, %v1659_v0  ;;  %v1674_v27 = vmul.f32 %v3504_v63, %v1578_v1 }
 0x30b   : > { %v1614_v38 = vadd.f32 1e-05, %v1550_v58  ;;  %v1715_v61 = vmul.f32 %v4317_v18, %v1676_v53  ;;  %v3506_v4 = vpop.eup %3505 }
 0x30c   : > { %v1754_v45 = vsel %vm1165_vm1, %v1698_v40, 0.0  ;;  %v1713_v35 = vmul.f32 %v4317_v18, %v1674_v27  ;;  %v1673_v24 = vmul.f32 %v3506_v4, %v1577_v23 }
 0x30d   : > { %3511 = vrsqrt.f32 %v1614_v38  ;;  %1758 = vadd.xlane.f32.xlu1 %v1757_v10  ;;  %v1805_v11 = vsel %vm1165_vm1, %v1715_v61, 0.0 }
 0x30e   : > { %1806 = vadd.xlane.f32.xlu0 %v1805_v11  ;;  %v1799_v41 = vsel %vm1165_vm1, %v1713_v35, 0.0  ;;  %v1712_v47 = vmul.f32 %v4317_v18, %v1673_v24 }
 0x310   : > { %v1796_v62 = vsel %vm1165_vm1, %v1712_v47, 0.0 }
 0x311   : > { %v3508_v20 = vpop.eup %3507  ;;  %1755 = vadd.xlane.f32.xlu1 %v1754_v45 }
 0x312   : > { %v1675_v57 = vmul.f32 %v3508_v20, %v1579_v52 }
 0x314   : > { %v3510_v25 = vpop.eup %3509  ;;  %v1714_v7 = vmul.f32 %v4317_v18, %v1675_v57 }
 0x315   : > { %1800 = vadd.xlane.f32.xlu1 %v1799_v41  ;;  %v1677_v44 = vmul.f32 %v3510_v25, %v1581_v6 }
 0x316   : > { %v1802_v14 = vsel %vm1165_vm1, %v1714_v7, 0.0 }
 0x317   : > { %v3512_v26 = vpop.eup %3511  ;;  %v1716_v39 = vmul.f32 %v4317_v18, %v1677_v44 }
 0x318   : > { %v1678_v59 = vmul.f32 %v3512_v26, %v1582_v50 }
 0x319   : > { %1797 = vadd.xlane.f32.xlu1 %v1796_v62  ;;  %v1808_v22 = vsel %vm1165_vm1, %v1716_v39, 0.0 }
 0x31a   : > { %1809 = vadd.xlane.f32.xlu0 %v1808_v22  ;;  %v1717_v15 = vmul.f32 %v4317_v18, %v1678_v59 }
 0x31c   : > { %v1811_v43 = vsel %vm1165_vm1, %v1717_v15, 0.0 }
 0x31d   : > { %1803 = vadd.xlane.f32.xlu1 %v1802_v14 }
 0x321   : > { %1812 = vadd.xlane.f32.xlu1 %v1811_v43 }
 0x331   : > { %v1720_v42 = vpop.xlane.xlu0 %1719 }
 0x332   : > { %v4573_v5 = vadd.f32 %v4561_v9, %v1720_v42 }
 0x333   : > { %v1723_v51 = vpop.xlane.xlu1 %1722 }
 0x334   : > { %v4564_v18 = vadd.f32 %v4561_v9, %v1723_v51  ;;  %v1885_v2 = vrot.slane %v4573_v5, %v4570_v28 }
 0x336   : > { %v1889_v31 = vrot.slane %v4564_v18, %v4570_v28 }
 0x338   : > { %v2011_v55 = vsel %vm2010_vm2, %v1889_v31, %v1885_v2 }
 0x33b   : > { %v4556_v37 = vpop.xlane.xlu0 %1764 }
 0x33e   : > { %v1729_v29 = vpop.xlane.xlu1 %1728 }
 0x33f   : > { %v4585_v49 = vadd.f32 %v4561_v9, %v1729_v29 }
 0x341   : > { %v1897_v56 = vrot.slane %v4585_v49, %v4570_v28 }
 0x342   : > { %v4558_v13 = vpop.xlane.xlu1 %1761 }
 0x347   : > { %v1726_v19 = vpop.xlane.xlu0 %1725 }
 0x348   : > { %v4567_v54 = vadd.f32 %v4561_v9, %v1726_v19  ;;  %v3655_v19 = vmov 0  }
 0x349   : > { %3448 = vset.pattern.permute.xlu1 %v3655_v19  ;;  %3447 = vset.pattern.permute.xlu0 %v3655_v19 }
 0x34a   : > { %v1893_v48 = vrot.slane %v4567_v54, %v4570_v28 }
 0x34b   : > { %v1771_v8 = vpop.xlane.xlu0 %1770 }
 0x34c   : > { %v2013_v34 = vsel %vm2012_vm3, %v1893_v48, %v2011_v55  ;;  %v4621_v52 = vadd.f32 %v4561_v9, %v1771_v8 }
 0x34d   : > { %v2015_v0 = vsel %vm2014_vm4, %v1897_v56, %v2013_v34 }
 0x34e   : > { %v1768_v36 = vpop.xlane.xlu1 %1767  ;;  %v1953_v44 = vrot.slane %v4621_v52, %v4570_v28 }
 0x34f   : > { %v1735_v32 = vpop.xlane.xlu0 %1734  ;;  %v4615_v24 = vadd.f32 %v4561_v9, %v1768_v36 }
 0x350   : > { %v4594_v17 = vadd.f32 %v4561_v9, %v1735_v32 }
 0x351   : > { %v1949_v25 = vrot.slane %v4615_v24, %v4570_v28 }
 0x352   : > { %v1905_v38 = vrot.slane %v4594_v17, %v4570_v28 }
 0x353   : > { %v2031_v26 = vsel %vm2010_vm2, %v1953_v44, %v1949_v25 }
 0x356   : > { %v1732_v16 = vpop.xlane.xlu1 %1731 }
 0x357   : > { %v1777_v3 = vpop.xlane.xlu0 %1776  ;;  %v4580_v30 = vadd.f32 %v4561_v9, %v1732_v16 }
 0x358   : > { %v4633_v50 = vadd.f32 %v4561_v9, %v1777_v3 }
 0x359   : > { %v1901_v12 = vrot.slane %v4580_v30, %v4570_v28 }
 0x35a   : > { %v1961_v59 = vrot.slane %v4633_v50, %v4570_v28 }
 0x35b   : > { %v2017_v1 = vsel %vm2016_vm5, %v1901_v12, %v2015_v0 }
 0x35c   : > { %v2019_v40 = vsel %vm2018_vm6, %v1905_v38, %v2017_v1 }
 0x362   : > { %v1774_v35 = vpop.xlane.xlu1 %1773 }
 0x363   : > { %v4618_v20 = vadd.f32 %v4561_v9, %v1774_v35 }
 0x365   : > { %v1957_v47 = vrot.slane %v4618_v20, %v4570_v28 }
 0x366   : > { %v1741_v60 = vpop.xlane.xlu0 %1740 }
 0x367   : > { %v4598_v63 = vadd.f32 %v4561_v9, %v1741_v60  ;;  %v2032_v62 = vsel %vm2012_vm3, %v1957_v47, %v2031_v26 }
 0x368   : > { %v2033_v14 = vsel %vm2014_vm4, %v1961_v59, %v2032_v62 }
 0x369   : > { %v1913_v10 = vrot.slane %v4598_v63, %v4570_v28 }
 0x36a   : > { %v1738_v58 = vpop.xlane.xlu0 %1737 }
 0x36b   : > { %v4601_v53 = vadd.f32 %v4561_v9, %v1738_v58 }
 0x36d   : > { %v1909_v61 = vrot.slane %v4601_v53, %v4570_v28 }
 0x36f   : > { %v2021_v27 = vsel %vm2020_vm7, %v1909_v61, %v2019_v40  ;;  %v4686_v40 = vadd.f32 %v4561_v9, %v4558_v13 }
 0x370   : > { %v2023_v4 = vsel %vm2022_vm8, %v1913_v10, %v2021_v27 }
 0x371   : > { %v2049_v11 = vsel %vm363_vm0, %v2023_v4, -inf }
 0x372   : > { %2050 = vmax.xlane.f32.xlu0 %v2049_v11  ;;  %v4694_v11 = vadd.f32 %v4561_v9, %v4556_v37  ;;  %v1941_v37 = vrot.slane %v4686_v40, %v4570_v28 }
 0x374   : > { %v1945_v44 = vrot.slane %v4694_v11, %v4570_v28 }
 0x376   : > { %v1783_v23 = vpop.xlane.xlu0 %1782 }
 0x377   : > { %v4642_v22 = vadd.f32 %v4561_v9, %v1783_v23 }
 0x379   : > { %v1969_v8 = vrot.slane %v4642_v22, %v4570_v28 }
 0x37a   : > { %v1747_v45 = vpop.xlane.xlu0 %1746 }
 0x37b   : > { %v4669_v34 = vadd.f32 %v4561_v9, %v1747_v45 }
 0x37d   : > { %v1921_v58 = vrot.slane %v4669_v34, %v4570_v28 }
 0x37e   : > { %v1780_v6 = vpop.xlane.xlu0 %1779  ;;  %v1744_v41 = vpop.xlane.xlu1 %1743 }
 0x37f   : > { %v4628_v57 = vadd.f32 %v4561_v9, %v1780_v6  ;;  %v4663_v2 = vadd.f32 %v4561_v9, %v1744_v41 }
 0x381   : > { %v1965_v7 = vrot.slane %v4628_v57, %v4570_v28  ;;  %v1917_v12 = vrot.slane %v4663_v2, %v4570_v28 }
 0x382   : > { %v1753_v15 = vpop.xlane.xlu0 %1752 }
 0x383   : > { %v2034_v51 = vsel %vm2016_vm5, %v1965_v7, %v2033_v14  ;;  %v4678_v1 = vadd.f32 %v4561_v9, %v1753_v15  ;;  %v2024_v38 = vsel %vm2010_vm2, %v1921_v58, %v1917_v12 }
 0x384   : > { %v2035_v32 = vsel %vm2018_vm6, %v1969_v8, %v2034_v51 }
 0x385   : > { %v1929_v23 = vrot.slane %v4678_v1, %v4570_v28 }
 0x386   : > { %v1750_v31 = vpop.xlane.xlu0 %1749 }
 0x387   : > { %v4666_v60 = vadd.f32 %v4561_v9, %v1750_v31 }
 0x389   : > { %v1925_v0 = vrot.slane %v4666_v60, %v4570_v28 }
 0x38a   : > { %v1789_v39 = vpop.xlane.xlu1 %1788  ;;  %v1792_v45 = vpop.xlane.xlu0 %1791 }
 0x38b   : > { %v4646_v43 = vadd.f32 %v4561_v9, %v1789_v39  ;;  %v2025_v27 = vsel %vm2012_vm3, %v1925_v0, %v2024_v38  ;;  %v4712_v26 = vadd.f32 %v4561_v9, %v1792_v45 }
 0x38c   : > { %v2026_v25 = vsel %vm2014_vm4, %v1929_v23, %v2025_v27 }
 0x38d   : > { %v1977_v36 = vrot.slane %v4646_v43, %v4570_v28  ;;  %v1981_v19 = vrot.slane %v4712_v26, %v4570_v28 }
 0x38e   : > { %v1786_v42 = vpop.xlane.xlu1 %1785 }
 0x38f   : > { %v4650_v29 = vadd.f32 %v4561_v9, %v1786_v42 }
 0x391   : > { %v1973_v21 = vrot.slane %v4650_v29, %v4570_v28 }
 0x393   : > { %v2036_v16 = vsel %vm2020_vm7, %v1973_v21, %v2035_v32 }
 0x394   : > { %v2037_v3 = vsel %vm2022_vm8, %v1977_v36, %v2036_v16 }
 0x395   : > { %v2055_v48 = vsel %vm363_vm0, %v2037_v3, -inf }
 0x396   : > { %2056 = vmax.xlane.f32.xlu0 %v2055_v48  ;;  %v1795_v55 = vpop.xlane.xlu1 %1794 }
 0x397   : > { %v4701_v6 = vadd.f32 %v4561_v9, %v1795_v55 }
 0x399   : > { %v1985_v59 = vrot.slane %v4701_v6, %v4570_v28 }
 0x39a   : > { %v1759_v56 = vpop.xlane.xlu1 %1758 }
 0x39b   : > { %v4682_v61 = vadd.f32 %v4561_v9, %v1759_v56  ;;  %v1807_v39 = vpop.xlane.xlu0 %1806  ;;  %v2038_v32 = vsel %vm2010_vm2, %v1985_v59, %v1981_v19 }
 0x39c   : > { %v4732_v16 = vadd.f32 %v4561_v9, %v1807_v39 }
 0x39d   : > { %v1937_v13 = vrot.slane %v4682_v61, %v4570_v28 }
 0x39e   : > { %v1756_v10 = vpop.xlane.xlu1 %1755  ;;  %v2001_v0 = vrot.slane %v4732_v16, %v4570_v28 }
 0x39f   : > { %v4690_v4 = vadd.f32 %v4561_v9, %v1756_v10 }
 0x3a1   : > { %v1933_v35 = vrot.slane %v4690_v4, %v4570_v28 }
 0x3a2   : > { %v1801_v41 = vpop.xlane.xlu1 %1800 }
 0x3a3   : > { %v2027_v47 = vsel %vm2016_vm5, %v1933_v35, %v2026_v25  ;;  %v4726_v8 = vadd.f32 %v4561_v9, %v1801_v41 }
 0x3a4   : > { %v2028_v62 = vsel %vm2018_vm6, %v1937_v13, %v2027_v47  ;;  %v4764_v47 = vsub.s32 2, %v3861_v33 }
 0x3a5   : > { %v2029_v7 = vsel %vm2020_vm7, %v1941_v37, %v2028_v62  ;;  %v1993_v12 = vrot.slane %v4726_v8, %v4570_v28  ;;  %v4761_v37 = vsub.s32 1, %v3861_v33 }
 0x3a6   : > { %v1798_v14 = vpop.xlane.xlu1 %1797  ;;  %v2030_v15 = vsel %vm2022_vm8, %v1945_v44, %v2029_v7 }
 0x3a7   : > { %v4720_v42 = vadd.f32 %v4561_v9, %v1798_v14  ;;  %v2052_v51 = vsel %vm363_vm0, %v2030_v15, -inf  ;;  %v1810_v21 = vpop.xlane.xlu0 %1809  ;;  %v4775_v15 = vsub.s32 4, %v3861_v33 }
 0x3a8   : > { %2053 = vmax.xlane.f32.xlu1 %v2052_v51  ;;  %v4736_v48 = vadd.f32 %v4561_v9, %v1810_v21 }
 0x3a9   : > { %v1989_v36 = vrot.slane %v4720_v42, %v4570_v28 }
 0x3aa   : > { %v1804_v31 = vpop.xlane.xlu1 %1803  ;;  %v2005_v10 = vrot.slane %v4736_v48, %v4570_v28 }
 0x3ab   : > { %v2039_v3 = vsel %vm2012_vm3, %v1989_v36, %v2038_v32  ;;  %v4739_v55 = vadd.f32 %v4561_v9, %v1804_v31  ;;  %v4780_v32 = vsub.s32 5, %v3861_v33 }
 0x3ac   : > { %v2040_v58 = vsel %vm2014_vm4, %v1993_v12, %v2039_v3 }
 0x3ad   : > { %v1997_v56 = vrot.slane %v4739_v55, %v4570_v28 }
 0x3ae   : > { %v1813_v38 = vpop.xlane.xlu1 %1812 }
 0x3af   : > { %v2041_v27 = vsel %vm2016_vm5, %v1997_v56, %v2040_v58  ;;  %v4752_v23 = vadd.f32 %v4561_v9, %v1813_v38  ;;  %v4767_v9 = vsub.s32 3, %v3861_v33 }
 0x3b0   : > { %v2042_v45 = vsel %vm2018_vm6, %v2001_v0, %v2041_v27  ;;  %v4790_v0 = vsub.s32 7, %v3861_v33 }
 0x3b1   : > { %v2009_v35 = vrot.slane %v4752_v23, %v4570_v28  ;;  %v2043_v13 = vsel %vm2020_vm7, %v2005_v10, %v2042_v45 }
 0x3b3   : > { %v2044_v25 = vsel %vm2022_vm8, %v2009_v35, %v2043_v13 }
 0x3b4   : > { %v2058_v41 = vsel %vm363_vm0, %v2044_v25, -inf }
 0x3b5   : > { %2059 = vmax.xlane.f32.xlu1 %v2058_v41 }
 0x3ff   : > { %v2051_v44 = vpop.xlane.xlu0 %2050 }
 0x400   : > { %v2068_v39 = vrot.slane %v2051_v44, %v3872_v46  ;;  %v2072_v62 = vrot.slane %v2051_v44, %v4761_v37  ;;  %v2076_v7 = vrot.slane %v2051_v44, %v4764_v47  ;;  %v2080_v51 = vrot.slane %v2051_v44, %v4767_v9 }
 0x401   : > { %v2084_v31 = vrot.slane %v2051_v44, %v4775_v15  ;;  %v2088_v12 = vrot.slane %v2051_v44, %v4780_v32 }
 0x402   : > { %v2225_v59 = vsub.f32 %v4573_v5, %v2068_v39  ;;  %v2226_v14 = vsub.f32 %v4564_v18, %v2072_v62  ;;  %v2227_v19 = vsub.f32 %v4567_v54, %v2076_v7  ;;  %v2228_v3 = vsub.f32 %v4585_v49, %v2080_v51 }
 0x403   : > { %v4785_v18 = vsub.s32 6, %v3861_v33  ;;  %v2229_v56 = vsub.f32 %v4580_v30, %v2084_v31  ;;  %v2230_v38 = vsub.f32 %v4594_v17, %v2088_v12  ;;  %v2096_v30 = vrot.slane %v2051_v44, %v4790_v0 }
 0x404   : > { %v2257_v21 = vmul.f32 1.442695, %v2225_v59  ;;  %v2259_v36 = vmul.f32 1.442695, %v2226_v14  ;;  %v2261_v5 = vmul.f32 1.442695, %v2227_v19 }
 0x405   : > { %v2263_v54 = vmul.f32 1.442695, %v2228_v3  ;;  %v2092_v58 = vrot.slane %v2051_v44, %v4785_v18  ;;  %v2265_v49 = vmul.f32 1.442695, %v2229_v56  ;;  %v2267_v33 = vmul.f32 1.442695, %v2230_v38 }
 0x406   : > { %3513 = vpow2.f32 %v2257_v21  ;;  %v2232_v17 = vsub.f32 %v4598_v63, %v2096_v30 }
 0x407   : > { %3515 = vpow2.f32 %v2259_v36  ;;  %v2231_v45 = vsub.f32 %v4601_v53, %v2092_v58 }
 0x408   : > { %3517 = vpow2.f32 %v2261_v5  ;;  %v2271_v41 = vmul.f32 1.442695, %v2232_v17 }
 0x409   : > { %3519 = vpow2.f32 %v2263_v54  ;;  %v2269_v13 = vmul.f32 1.442695, %v2231_v45 }
 0x40a   : > { %3521 = vpow2.f32 %v2265_v49 }
 0x40b   : > { %3523 = vpow2.f32 %v2267_v33 }
 0x40c   : > { %3525 = vpow2.f32 %v2269_v13 }
 0x40d   : > { %3527 = vpow2.f32 %v2271_v41 }
 0x410   : > { %v4794_v10 = vpop.eup %3513 }
 0x411   : > { %v4796_v27 = vpop.eup %3515  ;;  %2354 = vperm.xlu0 %3447, %v4794_v10  }
 0x412   : > { %2357 = vperm.xlu1 %3448, %v4796_v27   ;;  %v4802_v35 = vpop.eup %3517 }
 0x413   : > { %v4806_v25 = vpop.eup %3519 }
 0x414   : > { %v4809_v39 = vpop.eup %3521 }
 0x415   : > { %v4812_v53 = vpop.eup %3523 }
 0x416   : > { %2360 = vperm.xlu1 %3448, %v4802_v35   ;;  %v4819_v14 = vpop.eup %3525 }
 0x417   : > { %v4829_v54 = vpop.eup %3527 }
 0x41a   : > { %2363 = vperm.xlu1 %3448, %v4806_v25  }
 0x41e   : > { %2366 = vperm.xlu1 %3448, %v4809_v39  }
 0x422   : > { %2369 = vperm.xlu1 %3448, %v4812_v53  }
 0x423   : > { %v2057_v44 = vpop.xlane.xlu0 %2056 }
 0x424   : > { %v2132_v63 = vrot.slane %v2057_v44, %v3872_v46  ;;  %v2136_v62 = vrot.slane %v2057_v44, %v4761_v37  ;;  %v2140_v7 = vrot.slane %v2057_v44, %v4764_v47  ;;  %v2144_v59 = vrot.slane %v2057_v44, %v4767_v9 }
 0x425   : > { %v2156_v51 = vrot.slane %v2057_v44, %v4785_v18  ;;  %v2148_v31 = vrot.slane %v2057_v44, %v4775_v15  ;;  %v2160_v56 = vrot.slane %v2057_v44, %v4790_v0 }
 0x426   : > { %v2241_v19 = vsub.f32 %v4615_v24, %v2132_v63  ;;  %v2242_v21 = vsub.f32 %v4621_v52, %v2136_v62  ;;  %v2243_v36 = vsub.f32 %v4618_v20, %v2140_v7  ;;  %v2244_v3 = vsub.f32 %v4633_v50, %v2144_v59  ;;  %2372 = vperm.xlu1 %3448, %v4819_v14  }
 0x427   : > { %v2247_v58 = vsub.f32 %v4650_v29, %v2156_v51  ;;  %v2152_v52 = vrot.slane %v2057_v44, %v4780_v32  ;;  %v2245_v20 = vsub.f32 %v4628_v57, %v2148_v31  ;;  %v2248_v50 = vsub.f32 %v4646_v43, %v2160_v56 }
 0x428   : > { %v2289_v5 = vmul.f32 1.442695, %v2241_v19  ;;  %v2291_v12 = vmul.f32 1.442695, %v2242_v21  ;;  %v2293_v24 = vmul.f32 1.442695, %v2243_v36 }
 0x429   : > { %v2295_v38 = vmul.f32 1.442695, %v2244_v3  ;;  %v2301_v49 = vmul.f32 1.442695, %v2247_v58  ;;  %v2246_v30 = vsub.f32 %v4642_v22, %v2152_v52  ;;  %v2297_v45 = vmul.f32 1.442695, %v2245_v20 }
 0x42a   : > { %3529 = vpow2.f32 %v2289_v5  ;;  %2375 = vperm.xlu1 %3448, %v4829_v54   ;;  %v2303_v33 = vmul.f32 1.442695, %v2248_v50 }
 0x42b   : > { %3531 = vpow2.f32 %v2291_v12  ;;  %v2299_v29 = vmul.f32 1.442695, %v2246_v30 }
 0x42c   : > { %3533 = vpow2.f32 %v2293_v24 }
 0x42d   : > { %3535 = vpow2.f32 %v2295_v38 }
 0x42e   : > { %3537 = vpow2.f32 %v2301_v49 }
 0x42f   : > { %3539 = vpow2.f32 %v2297_v45 }
 0x430   : > { %3541 = vpow2.f32 %v2303_v33 }
 0x431   : > { %3543 = vpow2.f32 %v2299_v29 }
 0x434   : > { %v4837_v17 = vpop.eup %3529 }
 0x435   : > { %v4839_v13 = vpop.eup %3531  ;;  %2402 = vperm.xlu0 %3447, %v4837_v17   ;;  %v2054_v57 = vpop.xlane.xlu1 %2053 }
 0x436   : > { %2405 = vperm.xlu1 %3448, %v4839_v13   ;;  %v2100_v43 = vrot.slane %v2054_v57, %v3872_v46  ;;  %v2104_v22 = vrot.slane %v2054_v57, %v4761_v37  ;;  %v2108_v41 = vrot.slane %v2054_v57, %v4764_v47  ;;  %v2112_v44 = vrot.slane %v2054_v57, %v4767_v9  ;;  %v4847_v63 = vpop.eup %3533 }
 0x437   : > { %v2116_v62 = vrot.slane %v2054_v57, %v4775_v15  ;;  %v4853_v19 = vpop.eup %3535  ;;  %v2120_v21 = vrot.slane %v2054_v57, %v4780_v32  ;;  %v2128_v24 = vrot.slane %v2054_v57, %v4790_v0 }
 0x438   : > { %v2233_v7 = vsub.f32 %v4663_v2, %v2100_v43  ;;  %v2234_v59 = vsub.f32 %v4669_v34, %v2104_v22  ;;  %v2235_v51 = vsub.f32 %v4666_v60, %v2108_v41  ;;  %v2236_v36 = vsub.f32 %v4678_v1, %v2112_v44  ;;  %v4859_v5 = vpop.eup %3537 }
 0x439   : > { %2408 = vperm.xlu0 %3447, %v4847_v63   ;;  %v2124_v2 = vrot.slane %v2054_v57, %v4785_v18  ;;  %v2237_v34 = vsub.f32 %v4690_v4, %v2116_v62  ;;  %v4863_v12 = vpop.eup %3539  ;;  %v2238_v56 = vsub.f32 %v4682_v61, %v2120_v21  ;;  %v2240_v30 = vsub.f32 %v4694_v11, %v2128_v24 }
 0x43a   : > { %v2273_v31 = vmul.f32 1.442695, %v2233_v7  ;;  %v2275_v3 = vmul.f32 1.442695, %v2234_v59  ;;  %2411 = vperm.xlu1 %3448, %v4853_v19   ;;  %v2277_v60 = vmul.f32 1.442695, %v2235_v51  ;;  %v4868_v58 = vpop.eup %3541 }
 0x43b   : > { %v2279_v1 = vmul.f32 1.442695, %v2236_v36  ;;  %v2239_v52 = vsub.f32 %v4686_v40, %v2124_v2  ;;  %v2281_v4 = vmul.f32 1.442695, %v2237_v34  ;;  %v4872_v20 = vpop.eup %3543  ;;  %v2283_v38 = vmul.f32 1.442695, %v2238_v56 }
 0x43c   : > { %3545 = vpow2.f32 %v2273_v31  ;;  %v2287_v11 = vmul.f32 1.442695, %v2240_v30 }
 0x43d   : > { %3547 = vpow2.f32 %v2275_v3  ;;  %2420 = vperm.xlu0 %3447, %v4859_v5   ;;  %v2285_v45 = vmul.f32 1.442695, %v2239_v52 }
 0x43e   : > { %2414 = vperm.xlu1 %3448, %v4863_v12   ;;  %3549 = vpow2.f32 %v2277_v60 }
 0x43f   : > { %3551 = vpow2.f32 %v2279_v1 }
 0x440   : > { %3553 = vpow2.f32 %v2281_v4 }
 0x441   : > { %2423 = vperm.xlu0 %3447, %v4868_v58   ;;  %3555 = vpow2.f32 %v2283_v38 }
 0x442   : > { %2417 = vperm.xlu1 %3448, %v4872_v20   ;;  %v2060_v61 = vpop.xlane.xlu1 %2059  ;;  %3557 = vpow2.f32 %v2285_v45 }
 0x443   : > { %v2168_v50 = vrot.slane %v2060_v61, %v4761_v37  ;;  %v2172_v49 = vrot.slane %v2060_v61, %v4764_v47  ;;  %v2164_v40 = vrot.slane %v2060_v61, %v3872_v46  ;;  %v2176_v57 = vrot.slane %v2060_v61, %v4767_v9 }
 0x444   : > { %v2184_v44 = vrot.slane %v2060_v61, %v4780_v32  ;;  %v2180_v7 = vrot.slane %v2060_v61, %v4775_v15  ;;  %v2188_v21 = vrot.slane %v2060_v61, %v4785_v18  ;;  %v2192_v3 = vrot.slane %v2060_v61, %v4790_v0 }
 0x445   : > { %v2250_v33 = vsub.f32 %v4701_v6, %v2168_v50  ;;  %v2251_v43 = vsub.f32 %v4720_v42, %v2172_v49  ;;  %v2249_v62 = vsub.f32 %v4712_v26, %v2164_v40  ;;  %v2252_v59 = vsub.f32 %v4726_v8, %v2176_v57 }
 0x446   : > { %v4881_v29 = vpop.eup %3545  ;;  %v2254_v36 = vsub.f32 %v4732_v16, %v2184_v44  ;;  %v2253_v8 = vsub.f32 %v4739_v55, %v2180_v7  ;;  %v2255_v60 = vsub.f32 %v4736_v48, %v2188_v21  ;;  %v2256_v1 = vsub.f32 %v4752_v23, %v2192_v3 }
 0x447   : > { %v4885_v22 = vpop.eup %3547  ;;  %v2307_v41 = vmul.f32 1.442695, %v2250_v33  ;;  %2378 = vperm.xlu1 %3448, %v4881_v29   ;;  %v2309_v42 = vmul.f32 1.442695, %v2251_v43  ;;  %v2305_v26 = vmul.f32 1.442695, %v2249_v62 }
 0x448   : > { %2381 = vperm.xlu0 %3447, %v4885_v22   ;;  %v4891_v6 = vpop.eup %3549  ;;  %v2311_v2 = vmul.f32 1.442695, %v2252_v59  ;;  %v2315_v56 = vmul.f32 1.442695, %v2254_v36  ;;  %v2313_v24 = vmul.f32 1.442695, %v2253_v8 }
 0x449   : > { %3559 = vpow2.f32 %v2307_v41  ;;  %v4895_v51 = vpop.eup %3551  ;;  %v2317_v52 = vmul.f32 1.442695, %v2255_v60  ;;  %v2319_v48 = vmul.f32 1.442695, %v2256_v1 }
 0x44a   : > { %3561 = vpow2.f32 %v2287_v11  ;;  %v4901_v31 = vpop.eup %3553 }
 0x44b   : > { %2384 = vperm.xlu1 %3448, %v4891_v6   ;;  %3563 = vpow2.f32 %v2309_v42  ;;  %v4905_v34 = vpop.eup %3555 }
 0x44c   : > { %2387 = vperm.xlu0 %3447, %v4895_v51   ;;  %3565 = vpow2.f32 %v2305_v26  ;;  %v4910_v16 = vpop.eup %3557 }
 0x44d   : > { %3567 = vpow2.f32 %v2311_v2 }
 0x44e   : > { %3569 = vpow2.f32 %v2315_v56 }
 0x44f   : > { %2390 = vperm.xlu1 %3448, %v4901_v31   ;;  %3571 = vpow2.f32 %v2313_v24 }
 0x450   : > { %2393 = vperm.xlu0 %3447, %v4905_v34   ;;  %3573 = vpow2.f32 %v2317_v52 }
 0x451   : > { %3575 = vpow2.f32 %v2319_v48 }
 0x453   : > { %2396 = vperm.xlu1 %3448, %v4910_v16   ;;  %v4914_v55 = vpop.eup %3559 }
 0x454   : > { %2429 = vperm.xlu0 %3447, %v4914_v55   ;;  %v4917_v4 = vpop.eup %3561 }
 0x455   : > { %v4920_v38 = vpop.eup %3563 }
 0x456   : > { %v4923_v23 = vpop.eup %3565 }
 0x457   : > { %2399 = vperm.xlu1 %3448, %v4917_v4   ;;  %v4926_v61 = vpop.eup %3567 }
 0x458   : > { %2432 = vperm.xlu0 %3447, %v4920_v38   ;;  %v4929_v50 = vpop.eup %3569 }
 0x459   : > { %v4932_v49 = vpop.eup %3571 }
 0x45a   : > { %v4935_v30 = vpop.eup %3573 }
 0x45b   : > { %2426 = vperm.xlu1 %3448, %v4923_v23   ;;  %v4938_v45 = vpop.eup %3575 }
 0x45c   : > { %2435 = vperm.xlu0 %3447, %v4926_v61   ;;  %5170 = vst [vmem:[#allocation6_spill] sm:$0xff] %v4938_v45 }
 0x45f   : > { %2441 = vperm.xlu1 %3448, %v4929_v50  }
 0x460   : > { %2438 = vperm.xlu0 %3447, %v4932_v49  }
 0x463   : > { %2444 = vperm.xlu1 %3448, %v4935_v30  }
 0x464   : > { %2447 = vperm.xlu0 %3447, %v4938_v45  }
 0x490   : > { %v2355_v41 = vpop.permute.xlu0 %2354 }
 0x491   : > { %v2358_v40 = vpop.permute.xlu1 %2357  ;;  %v2452_v44 = vrot.slane %v2355_v41, %v4570_v28 }
 0x492   : > { %v2456_v62 = vrot.slane %v2358_v40, %v4570_v28 }
 0x494   : > { %v2577_v36 = vsel %vm2010_vm2, %v2456_v62, %v2452_v44 }
 0x495   : > { %v2361_v33 = vpop.permute.xlu1 %2360 }
 0x496   : > { %v2460_v7 = vrot.slane %v2361_v33, %v4570_v28 }
 0x498   : > { %v2578_v3 = vsel %vm2012_vm3, %v2460_v7, %v2577_v36 }
 0x499   : > { %v2364_v57 = vpop.permute.xlu1 %2363 }
 0x49a   : > { %v2464_v59 = vrot.slane %v2364_v57, %v4570_v28 }
 0x49c   : > { %v2579_v2 = vsel %vm2014_vm4, %v2464_v59, %v2578_v3 }
 0x49d   : > { %v2367_v43 = vpop.permute.xlu1 %2366 }
 0x49e   : > { %v2468_v42 = vrot.slane %v2367_v43, %v4570_v28 }
 0x4a0   : > { %v2580_v60 = vsel %vm2016_vm5, %v2468_v42, %v2579_v2 }
 0x4a1   : > { %v2370_v11 = vpop.permute.xlu1 %2369 }
 0x4a2   : > { %v2472_v26 = vrot.slane %v2370_v11, %v4570_v28 }
 0x4a4   : > { %v2581_v1 = vsel %vm2018_vm6, %v2472_v26, %v2580_v60 }
 0x4a5   : > { %v2373_v21 = vpop.permute.xlu1 %2372 }
 0x4a6   : > { %v2476_v8 = vrot.slane %v2373_v21, %v4570_v28 }
 0x4a8   : > { %v2582_v52 = vsel %vm2020_vm7, %v2476_v8, %v2581_v1 }
 0x4a9   : > { %v2376_v56 = vpop.permute.xlu1 %2375 }
 0x4aa   : > { %v2480_v24 = vrot.slane %v2376_v56, %v4570_v28 }
 0x4ac   : > { %v2583_v48 = vsel %vm2022_vm8, %v2480_v24, %v2582_v52 }
 0x4ad   : > { %v2609_v40 = vsel %vm363_vm0, %v2583_v48, 0.0 }
 0x4ae   : > { %2610 = vadd.xlane.f32.xlu1 %v2609_v40 }
 0x4b4   : > { %v2403_v33 = vpop.permute.xlu0 %2402 }
 0x4b5   : > { %v2406_v57 = vpop.permute.xlu1 %2405  ;;  %v2516_v36 = vrot.slane %v2403_v33, %v4570_v28 }
 0x4b6   : > { %v2520_v26 = vrot.slane %v2406_v57, %v4570_v28 }
 0x4b8   : > { %v2409_v43 = vpop.permute.xlu0 %2408  ;;  %v2591_v24 = vsel %vm2010_vm2, %v2520_v26, %v2516_v36 }
 0x4b9   : > { %v2412_v41 = vpop.permute.xlu1 %2411  ;;  %v2524_v60 = vrot.slane %v2409_v43, %v4570_v28 }
 0x4ba   : > { %v2528_v52 = vrot.slane %v2412_v41, %v4570_v28 }
 0x4bb   : > { %v2592_v57 = vsel %vm2012_vm3, %v2524_v60, %v2591_v24 }
 0x4bc   : > { %v2421_v11 = vpop.permute.xlu0 %2420  ;;  %v2593_v36 = vsel %vm2014_vm4, %v2528_v52, %v2592_v57 }
 0x4bd   : > { %v2415_v44 = vpop.permute.xlu1 %2414 }
 0x4c0   : > { %v2424_v7 = vpop.permute.xlu0 %2423 }
 0x4c1   : > { %v2418_v62 = vpop.permute.xlu1 %2417 }
 0x4c6   : > { %v2379_v59 = vpop.permute.xlu1 %2378 }
 0x4c7   : > { %v2382_v42 = vpop.permute.xlu0 %2381  ;;  %v2484_v8 = vrot.slane %v2379_v59, %v4570_v28 }
 0x4c8   : > { %v2488_v3 = vrot.slane %v2382_v42, %v4570_v28  ;;  %v2532_v42 = vrot.slane %v2415_v44, %v4570_v28 }
 0x4ca   : > { %v2385_v21 = vpop.permute.xlu1 %2384  ;;  %v2584_v48 = vsel %vm2010_vm2, %v2488_v3, %v2484_v8  ;;  %v2594_v3 = vsel %vm2016_vm5, %v2532_v42, %v2593_v36 }
 0x4cb   : > { %v2388_v2 = vpop.permute.xlu0 %2387  ;;  %v2492_v56 = vrot.slane %v2385_v21, %v4570_v28  ;;  %v2536_v21 = vrot.slane %v2418_v62, %v4570_v28 }
 0x4cc   : > { %v2496_v40 = vrot.slane %v2388_v2, %v4570_v28 }
 0x4cd   : > { %v2585_v59 = vsel %vm2012_vm3, %v2492_v56, %v2584_v48  ;;  %v2595_v60 = vsel %vm2018_vm6, %v2536_v21, %v2594_v3  ;;  %v2540_v56 = vrot.slane %v2421_v11, %v4570_v28 }
 0x4ce   : > { %v2391_v1 = vpop.permute.xlu1 %2390  ;;  %v2586_v26 = vsel %vm2014_vm4, %v2496_v40, %v2585_v59 }
 0x4cf   : > { %v2394_v33 = vpop.permute.xlu0 %2393  ;;  %v2500_v43 = vrot.slane %v2391_v1, %v4570_v28  ;;  %v2596_v40 = vsel %vm2020_vm7, %v2540_v56, %v2595_v60 }
 0x4d0   : > { %v2504_v41 = vrot.slane %v2394_v33, %v4570_v28  ;;  %v2544_v33 = vrot.slane %v2424_v7, %v4570_v28 }
 0x4d1   : > { %v2587_v8 = vsel %vm2016_vm5, %v2500_v43, %v2586_v26 }
 0x4d2   : > { %v2397_v45 = vpop.permute.xlu1 %2396  ;;  %v2588_v24 = vsel %vm2018_vm6, %v2504_v41, %v2587_v8  ;;  %v2597_v43 = vsel %vm2022_vm8, %v2544_v33, %v2596_v40 }
 0x4d3   : > { %v2508_v2 = vrot.slane %v2397_v45, %v4570_v28  ;;  %v2430_v44 = vpop.permute.xlu0 %2429  ;;  %v2615_v3 = vsel %vm363_vm0, %v2597_v43, 0.0 }
 0x4d4   : > { %v2552_v59 = vrot.slane %v2430_v44, %v4570_v28 }
 0x4d5   : > { %v2589_v48 = vsel %vm2020_vm7, %v2508_v2, %v2588_v24 }
 0x4d6   : > { %v2400_v1 = vpop.permute.xlu1 %2399 }
 0x4d7   : > { %v2512_v62 = vrot.slane %v2400_v1, %v4570_v28  ;;  %v2433_v52 = vpop.permute.xlu0 %2432 }
 0x4d8   : > { %v2556_v36 = vrot.slane %v2433_v52, %v4570_v28 }
 0x4d9   : > { %v2590_v57 = vsel %vm2022_vm8, %v2512_v62, %v2589_v48 }
 0x4da   : > { %v2427_v45 = vpop.permute.xlu1 %2426  ;;  %v2612_v42 = vsel %vm363_vm0, %v2590_v57, 0.0 }
 0x4db   : > { %v2548_v11 = vrot.slane %v2427_v45, %v4570_v28  ;;  %2613 = vadd.xlane.f32.xlu0 %v2612_v42  ;;  %v2436_v21 = vpop.permute.xlu0 %2435 }
 0x4dc   : > { %v2560_v26 = vrot.slane %v2436_v21, %v4570_v28 }
 0x4dd   : > { %v2598_v41 = vsel %vm2010_vm2, %v2552_v59, %v2548_v11 }
 0x4de   : > { %v2442_v7 = vpop.permute.xlu1 %2441  ;;  %v2599_v8 = vsel %vm2012_vm3, %v2556_v36, %v2598_v41 }
 0x4df   : > { %2616 = vadd.xlane.f32.xlu0 %v2615_v3  ;;  %v2439_v2 = vpop.permute.xlu0 %2438  ;;  %v2600_v60 = vsel %vm2014_vm4, %v2560_v26, %v2599_v8  ;;  %v2568_v56 = vrot.slane %v2442_v7, %v4570_v28 }
 0x4e0   : > { %v2564_v44 = vrot.slane %v2439_v2, %v4570_v28 }
 0x4e2   : > { %v2445_v1 = vpop.permute.xlu1 %2444  ;;  %v2601_v62 = vsel %vm2016_vm5, %v2564_v44, %v2600_v60 }
 0x4e3   : > { %v2572_v24 = vrot.slane %v2445_v1, %v4570_v28  ;;  %v2448_v52 = vpop.permute.xlu0 %2447  ;;  %v2602_v48 = vsel %vm2018_vm6, %v2568_v56, %v2601_v62 }
 0x4e4   : > { %v2576_v40 = vrot.slane %v2448_v52, %v4570_v28 }
 0x4e5   : > { %v2603_v33 = vsel %vm2020_vm7, %v2572_v24, %v2602_v48 }
 0x4e6   : > { %v2604_v57 = vsel %vm2022_vm8, %v2576_v40, %v2603_v33 }
 0x4e7   : > { %v2618_v45 = vsel %vm363_vm0, %v2604_v57, 0.0 }
 0x4e8   : > { %2619 = vadd.xlane.f32.xlu1 %v2618_v45 }
 0x53b   : > { %v2611_v42 = vpop.xlane.xlu1 %2610 }
 0x53c   : > { %3577 = vrcp.f32 %v2611_v42 }
 0x546   : > { %v3578_v59 = vpop.eup %3577 }
 0x547   : > { %v2636_v11 = vrot.slane %v3578_v59, %v4761_v37  ;;  %v2632_v43 = vrot.slane %v3578_v59, %v3872_v46  ;;  %v2640_v41 = vrot.slane %v3578_v59, %v4764_v47  ;;  %v2644_v26 = vrot.slane %v3578_v59, %v4767_v9 }
 0x548   : > { %v2648_v8 = vrot.slane %v3578_v59, %v4775_v15  ;;  %v2652_v2 = vrot.slane %v3578_v59, %v4780_v32  ;;  %v2656_v44 = vrot.slane %v3578_v59, %v4785_v18  ;;  %v2660_v60 = vrot.slane %v3578_v59, %v4790_v0 }
 0x549   : > { %v2790_v21 = vmul.f32 %v4796_v27, %v2636_v11  ;;  %v2789_v36 = vmul.f32 %v4794_v10, %v2632_v43  ;;  %v2791_v7 = vmul.f32 %v4802_v35, %v2640_v41  ;;  %v2792_v3 = vmul.f32 %v4806_v25, %v2644_v26 }
 0x54a   : > { %v2793_v27 = vmul.f32 %v4809_v39, %v2648_v8  ;;  %v2794_v10 = vmul.f32 %v4812_v53, %v2652_v2  ;;  %v2795_v35 = vmul.f32 %v4819_v14, %v2656_v44  ;;  %v2796_v25 = vmul.f32 %v4829_v54, %v2660_v60 }
 0x54b   : > { %2857 = vperm.xlu1 %3448, %v2790_v21   ;;  %2854 = vperm.xlu0 %3447, %v2789_v36  }
 0x54f   : > { %2860 = vperm.xlu1 %3448, %v2791_v7   ;;  %2863 = vperm.xlu0 %3447, %v2792_v3  }
 0x553   : > { %2866 = vperm.xlu1 %3448, %v2793_v27   ;;  %2869 = vperm.xlu0 %3447, %v2794_v10  }
 0x557   : > { %2872 = vperm.xlu1 %3448, %v2795_v35   ;;  %2875 = vperm.xlu0 %3447, %v2796_v25   ;;  %v5171_v35 = vld [vmem:[#allocation6_spill] sm:$0xff] }
 0x568   : > { %v2614_v56 = vpop.xlane.xlu0 %2613 }
 0x56c   : > { %v2617_v1 = vpop.xlane.xlu0 %2616 }
 0x56d   : > { %3579 = vrcp.f32 %v2617_v1 }
 0x56e   : > { %3581 = vrcp.f32 %v2614_v56 }
 0x577   : > { %v3580_v62 = vpop.eup %3579 }
 0x578   : > { %v2696_v39 = vrot.slane %v3580_v62, %v3872_v46  ;;  %v2700_v53 = vrot.slane %v3580_v62, %v4761_v37  ;;  %v2704_v48 = vrot.slane %v3580_v62, %v4764_v47  ;;  %v2708_v14 = vrot.slane %v3580_v62, %v4767_v9  ;;  %v3582_v45 = vpop.eup %3581 }
 0x579   : > { %v2716_v33 = vrot.slane %v3580_v62, %v4780_v32  ;;  %v2712_v57 = vrot.slane %v3580_v62, %v4775_v15  ;;  %v2664_v59 = vrot.slane %v3582_v45, %v3872_v46  ;;  %v2720_v11 = vrot.slane %v3580_v62, %v4785_v18 }
 0x57a   : > { %v2805_v24 = vmul.f32 %v4837_v17, %v2696_v39  ;;  %v2806_v52 = vmul.f32 %v4839_v13, %v2700_v53  ;;  %v2807_v54 = vmul.f32 %v4847_v63, %v2704_v48  ;;  %v2808_v40 = vmul.f32 %v4853_v19, %v2708_v14  ;;  %v2620_v17 = vpop.xlane.xlu1 %2619 }
 0x57b   : > { %v2810_v13 = vmul.f32 %v4872_v20, %v2716_v33  ;;  %v2809_v42 = vmul.f32 %v4863_v12, %v2712_v57  ;;  %3583 = vrcp.f32 %v2620_v17  ;;  %v2797_v63 = vmul.f32 %v4881_v29, %v2664_v59 }
 0x57c   : > { %2902 = vperm.xlu1 %3448, %v2805_v24   ;;  %2905 = vperm.xlu0 %3447, %v2806_v52   ;;  %v2811_v19 = vmul.f32 %v4859_v5, %v2720_v11  ;;  %v2672_v43 = vrot.slane %v3582_v45, %v4764_v47  ;;  %v2724_v21 = vrot.slane %v3580_v62, %v4790_v0 }
 0x57d   : > { %v2680_v36 = vrot.slane %v3582_v45, %v4775_v15  ;;  %v2668_v41 = vrot.slane %v3582_v45, %v4761_v37  ;;  %v2692_v26 = vrot.slane %v3582_v45, %v4790_v0  ;;  %v2676_v7 = vrot.slane %v3582_v45, %v4767_v9 }
 0x57e   : > { %v2799_v20 = vmul.f32 %v4891_v6, %v2672_v43  ;;  %v2812_v12 = vmul.f32 %v4868_v58, %v2724_v21  ;;  %v2684_v8 = vrot.slane %v3582_v45, %v4780_v32  ;;  %v2688_v27 = vrot.slane %v3582_v45, %v4785_v18 }
 0x57f   : > { %v2801_v29 = vmul.f32 %v4901_v31, %v2680_v36  ;;  %v2798_v5 = vmul.f32 %v4885_v22, %v2668_v41  ;;  %v2804_v6 = vmul.f32 %v4917_v4, %v2692_v26  ;;  %v2800_v58 = vmul.f32 %v4895_v51, %v2676_v7 }
 0x580   : > { %2908 = vperm.xlu1 %3448, %v2807_v54   ;;  %2911 = vperm.xlu0 %3447, %v2808_v40   ;;  %v2802_v31 = vmul.f32 %v4905_v34, %v2684_v8  ;;  %v2803_v4 = vmul.f32 %v4910_v16, %v2688_v27 }
 0x584   : > { %2917 = vperm.xlu1 %3448, %v2810_v13   ;;  %2914 = vperm.xlu0 %3447, %v2809_v42  }
 0x585   : > { %v3584_v3 = vpop.eup %3583 }
 0x586   : > { %v2732_v2 = vrot.slane %v3584_v3, %v4761_v37  ;;  %v2736_v10 = vrot.slane %v3584_v3, %v4764_v47  ;;  %v2740_v44 = vrot.slane %v3584_v3, %v4767_v9  ;;  %v2728_v37 = vrot.slane %v3584_v3, %v3872_v46 }
 0x587   : > { %v2748_v60 = vrot.slane %v3584_v3, %v4780_v32  ;;  %v2744_v47 = vrot.slane %v3584_v3, %v4775_v15  ;;  %v2752_v9 = vrot.slane %v3584_v3, %v4785_v18  ;;  %v2756_v46 = vrot.slane %v3584_v3, %v4790_v0 }
 0x588   : > { %2878 = vperm.xlu1 %3448, %v2797_v63   ;;  %2920 = vperm.xlu0 %3447, %v2811_v19   ;;  %v2814_v22 = vmul.f32 %v4914_v55, %v2732_v2  ;;  %v2815_v51 = vmul.f32 %v4920_v38, %v2736_v10  ;;  %v2816_v34 = vmul.f32 %v4926_v61, %v2740_v44 }
 0x589   : > { %v2813_v55 = vmul.f32 %v4923_v23, %v2728_v37  ;;  %v2818_v16 = vmul.f32 %v4929_v50, %v2748_v60  ;;  %v2817_v38 = vmul.f32 %v4932_v49, %v2744_v47  ;;  %v2819_v61 = vmul.f32 %v4935_v30, %v2752_v9 }
 0x58a   : > { %v2820_v23 = vmul.f32 %v5171_v35, %v2756_v46 }
 0x58c   : > { %2884 = vperm.xlu1 %3448, %v2799_v20   ;;  %2923 = vperm.xlu0 %3447, %v2812_v12  }
 0x590   : > { %2890 = vperm.xlu1 %3448, %v2801_v29   ;;  %2881 = vperm.xlu0 %3447, %v2798_v5  }
 0x594   : > { %2899 = vperm.xlu1 %3448, %v2804_v6   ;;  %2887 = vperm.xlu0 %3447, %v2800_v58  }
 0x598   : > { %2893 = vperm.xlu0 %3447, %v2802_v31   ;;  %2929 = vperm.xlu1 %3448, %v2814_v22  }
 0x59c   : > { %2896 = vperm.xlu0 %3447, %v2803_v4   ;;  %2932 = vperm.xlu1 %3448, %v2815_v51  }
 0x5a0   : > { %2935 = vperm.xlu1 %3448, %v2816_v34   ;;  %2926 = vperm.xlu0 %3447, %v2813_v55  }
 0x5a4   : > { %2941 = vperm.xlu1 %3448, %v2818_v16   ;;  %2938 = vperm.xlu0 %3447, %v2817_v38  }
 0x5a8   : > { %2944 = vperm.xlu1 %3448, %v2819_v61   ;;  %2947 = vperm.xlu0 %3447, %v2820_v23  }
 0x5ca   : > { %v2855_v32 = vpop.permute.xlu0 %2854  ;;  %v2858_v15 = vpop.permute.xlu1 %2857 }
 0x5cb   : > { %v2952_v25 = vrot.slane %v2855_v32, %v4570_v28  ;;  %v2956_v50 = vrot.slane %v2858_v15, %v4570_v28 }
 0x5cd   : > { %v3077_v0 = vsel %vm2010_vm2, %v2956_v50, %v2952_v25 }
 0x5ce   : > { %v2864_v56 = vpop.permute.xlu0 %2863  ;;  %v2861_v49 = vpop.permute.xlu1 %2860 }
 0x5cf   : > { %v2960_v18 = vrot.slane %v2861_v49, %v4570_v28  ;;  %v2964_v1 = vrot.slane %v2864_v56, %v4570_v28 }
 0x5d1   : > { %v3078_v30 = vsel %vm2012_vm3, %v2960_v18, %v3077_v0 }
 0x5d2   : > { %v2870_v62 = vpop.permute.xlu0 %2869  ;;  %v2867_v39 = vpop.permute.xlu1 %2866  ;;  %v3079_v52 = vsel %vm2014_vm4, %v2964_v1, %v3078_v30 }
 0x5d3   : > { %v2968_v53 = vrot.slane %v2867_v39, %v4570_v28  ;;  %v2972_v24 = vrot.slane %v2870_v62, %v4570_v28 }
 0x5d5   : > { %v3080_v48 = vsel %vm2016_vm5, %v2968_v53, %v3079_v52 }
 0x5d6   : > { %v2876_v14 = vpop.permute.xlu0 %2875  ;;  %v2873_v54 = vpop.permute.xlu1 %2872  ;;  %v3081_v57 = vsel %vm2018_vm6, %v2972_v24, %v3080_v48 }
 0x5d7   : > { %v2980_v40 = vrot.slane %v2876_v14, %v4570_v28  ;;  %v2976_v33 = vrot.slane %v2873_v54, %v4570_v28 }
 0x5d9   : > { %v3082_v45 = vsel %vm2020_vm7, %v2976_v33, %v3081_v57 }
 0x5da   : > { %v3083_v17 = vsel %vm2022_vm8, %v2980_v40, %v3082_v45 }
 0x5db   : > { %3109 = vst.msk [vmem:[%s5086_s26] sm:$0xff] %vm363_vm0, %v3083_v17 }
 0x5fb   : > { %v2906_v13 = vpop.permute.xlu0 %2905  ;;  %v2903_v42 = vpop.permute.xlu1 %2902 }
 0x5fc   : > { %v3020_v5 = vrot.slane %v2906_v13, %v4570_v28  ;;  %v3016_v26 = vrot.slane %v2903_v42, %v4570_v28 }
 0x5fe   : > { %v3091_v31 = vsel %vm2010_vm2, %v3020_v5, %v3016_v26 }
 0x5ff   : > { %v2912_v59 = vpop.permute.xlu0 %2911  ;;  %v2909_v11 = vpop.permute.xlu1 %2908 }
 0x600   : > { %v3024_v7 = vrot.slane %v2909_v11, %v4570_v28  ;;  %v3028_v22 = vrot.slane %v2912_v59, %v4570_v28 }
 0x602   : > { %v3092_v10 = vsel %vm2012_vm3, %v3024_v7, %v3091_v31 }
 0x603   : > { %v2915_v63 = vpop.permute.xlu0 %2914  ;;  %v2918_v19 = vpop.permute.xlu1 %2917  ;;  %v3093_v60 = vsel %vm2014_vm4, %v3028_v22, %v3092_v10 }
 0x604   : > { %v3032_v4 = vrot.slane %v2915_v63, %v4570_v28  ;;  %v3036_v47 = vrot.slane %v2918_v19, %v4570_v28 }
 0x606   : > { %v3094_v38 = vsel %vm2016_vm5, %v3032_v4, %v3093_v60 }
 0x607   : > { %v2921_v43 = vpop.permute.xlu0 %2920  ;;  %v2879_v21 = vpop.permute.xlu1 %2878  ;;  %v3095_v50 = vsel %vm2018_vm6, %v3036_v47, %v3094_v38 }
 0x608   : > { %v2984_v3 = vrot.slane %v2879_v21, %v4570_v28  ;;  %v3040_v9 = vrot.slane %v2921_v43, %v4570_v28 }
 0x60a   : > { %v3096_v49 = vsel %vm2020_vm7, %v3040_v9, %v3095_v50 }
 0x60b   : > { %v2924_v20 = vpop.permute.xlu0 %2923  ;;  %v2885_v12 = vpop.permute.xlu1 %2884 }
 0x60c   : > { %v2992_v27 = vrot.slane %v2885_v12, %v4570_v28  ;;  %v3044_v35 = vrot.slane %v2924_v20, %v4570_v28 }
 0x60e   : > { %v3097_v30 = vsel %vm2022_vm8, %v3044_v35, %v3096_v49 }
 0x60f   : > { %v2882_v36 = vpop.permute.xlu0 %2881  ;;  %v2891_v41 = vpop.permute.xlu1 %2890  ;;  %3111 = vst.msk [vmem:[%s5086_s26 + $0x10] sm:$0xff] %vm363_vm0, %v3097_v30 }
 0x610   : > { %v2988_v29 = vrot.slane %v2882_v36, %v4570_v28  ;;  %v3000_v16 = vrot.slane %v2891_v41, %v4570_v28 }
 0x612   : > { %v3084_v8 = vsel %vm2010_vm2, %v2988_v29, %v2984_v3 }
 0x613   : > { %v2888_v6 = vpop.permute.xlu0 %2887  ;;  %v2900_v58 = vpop.permute.xlu1 %2899  ;;  %v3085_v37 = vsel %vm2012_vm3, %v2992_v27, %v3084_v8 }
 0x614   : > { %v2996_v2 = vrot.slane %v2888_v6, %v4570_v28  ;;  %v3012_v15 = vrot.slane %v2900_v58, %v4570_v28 }
 0x616   : > { %v3086_v34 = vsel %vm2014_vm4, %v2996_v2, %v3085_v37 }
 0x617   : > { %v2894_v51 = vpop.permute.xlu0 %2893  ;;  %v2930_v44 = vpop.permute.xlu1 %2929  ;;  %v3087_v23 = vsel %vm2016_vm5, %v3000_v16, %v3086_v34 }
 0x618   : > { %v3004_v55 = vrot.slane %v2894_v51, %v4570_v28  ;;  %v3052_v62 = vrot.slane %v2930_v44, %v4570_v28 }
 0x61a   : > { %v3088_v25 = vsel %vm2018_vm6, %v3004_v55, %v3087_v23 }
 0x61b   : > { %v2897_v46 = vpop.permute.xlu0 %2896  ;;  %v2933_v61 = vpop.permute.xlu1 %2932 }
 0x61c   : > { %v3008_v32 = vrot.slane %v2897_v46, %v4570_v28  ;;  %v3056_v53 = vrot.slane %v2933_v61, %v4570_v28 }
 0x61e   : > { %v3089_v56 = vsel %vm2020_vm7, %v3008_v32, %v3088_v25 }
 0x61f   : > { %v3090_v18 = vsel %vm2022_vm8, %v3012_v15, %v3089_v56  ;;  %v2927_v0 = vpop.permute.xlu0 %2926  ;;  %v2936_v1 = vpop.permute.xlu1 %2935 }
 0x620   : > { %3110 = vst.msk [vmem:[%s5086_s26 + $0x8] sm:$0xff] %vm363_vm0, %v3090_v18  ;;  %v3048_v39 = vrot.slane %v2927_v0, %v4570_v28  ;;  %v3060_v52 = vrot.slane %v2936_v1, %v4570_v28 }
 0x622   : > { %v3098_v24 = vsel %vm2010_vm2, %v3052_v62, %v3048_v39 }
 0x623   : > { %v3099_v48 = vsel %vm2012_vm3, %v3056_v53, %v3098_v24  ;;  %v2939_v14 = vpop.permute.xlu0 %2938  ;;  %v2942_v54 = vpop.permute.xlu1 %2941 }
 0x624   : > { %v3100_v40 = vsel %vm2014_vm4, %v3060_v52, %v3099_v48  ;;  %v3064_v33 = vrot.slane %v2939_v14, %v4570_v28  ;;  %v3068_v57 = vrot.slane %v2942_v54, %v4570_v28 }
 0x626   : > { %v3101_v45 = vsel %vm2016_vm5, %v3064_v33, %v3100_v40 }
 0x627   : > { %v2948_v17 = vpop.permute.xlu0 %2947  ;;  %v2945_v13 = vpop.permute.xlu1 %2944  ;;  %v3102_v11 = vsel %vm2018_vm6, %v3068_v57, %v3101_v45 }
 0x628   : > { %v3076_v42 = vrot.slane %v2948_v17, %v4570_v28  ;;  %v3072_v59 = vrot.slane %v2945_v13, %v4570_v28 }
 0x62a   : > { %v3103_v63 = vsel %vm2020_vm7, %v3072_v59, %v3102_v11 }
 0x62b   : > { %v3104_v19 = vsel %vm2022_vm8, %v3076_v42, %v3103_v63 }
 0x62c   : > { %3112 = vst.msk [vmem:[%s5086_s26 + $0x18] sm:$0xff] %vm363_vm0, %v3104_v19 }
 0x62d PF: > { %p19_p7 = scmp.ge.s32.totalorder %s3724_s11, 4   ;;  %s5172_s29 = smov %s3641_s30 }
 0x62e   : > { %s5173_s30 = smov %s3645_s9  ;;  %s5174_s9 = smov %s3734_s14 }
 0x62f   : > { %s5175_s10 = smov %s3724_s11  ;;  %21 = sbr.rel (!%p19_p7) target bundleno = 5 (0x5), region = 95 }
 0x636   :  { %3135 = vsyncpa [#allocation4], 1 }
 0x637   :  { %3137 = vsyncpa [#allocation4 + $0x1], 1 }

</bundles_post_ra>
